<compile_context>
chip_gen: v7x
topology: tpu7x:2x2x1
jax: 0.10.0
libtpu: 0.0.40
codegen_flags: <defaults>
</compile_context>

<pallas_src>
import math
from functools import partial

import jax
import jax.numpy as jnp
from jax.experimental import pallas as pl
from jax.experimental.pallas import tpu as pltpu


def _round_up(x, m):
    return ((x + m - 1) // m) * m


def _vmem_limit_bytes():
    """Generation-aware scoped-VMEM budget (v7x only has 64 MiB physical)."""
    try:
        cap = int(pltpu.get_tpu_info().vmem_capacity_bytes)
        return max(32 * 1024 * 1024, min(cap - 24 * 1024 * 1024, 112 * 1024 * 1024))
    except Exception:
        return 40 * 1024 * 1024          # conservative fallback (fits v7x)


_VMEM_LIMIT = _vmem_limit_bytes()


# ----------------------------------------------------------------------------
# Pallas kernel 1 (fast path): fused 1x1-conv matmul + GroupNorm
#   grid = (B, T); the f32 (D, HWp) conv output lives in VMEM scratch, the
#   bf16 output slab is a resident output block written on the last HW tile.
# ----------------------------------------------------------------------------
def _proj_gn_fused_kernel(x_ref, w_ref, ga_ref, b_ref, g_ref, be_ref,
                          o_ref, z_ref, ssum_ref, ssq_ref, *, n_hw, eps):
    t = pl.program_id(1)
    nt = pl.num_programs(1)
    tile = x_ref.shape[2]
    n_tiles = z_ref.shape[1] // tile

    # 1x1-conv matmul for this HW tile (bf16 MXU operands, f32 accumulation).
    z = jnp.dot(w_ref[...], x_ref[0], preferred_element_type=jnp.float32)   # (D, tile)
    off = pl.multiple_of(t * tile, 128)
    z_ref[:, pl.ds(off, tile)] = z

    # Lane-axis (XLU) reductions; zero-padded HW columns contribute exactly 0.
    s = jnp.sum(z, axis=1, keepdims=True)                    # (D, 1)
    sq = jnp.sum(z * z, axis=1, keepdims=True)               # (D, 1)

    @pl.when(t == 0)
    def _():
        ssum_ref[...] = s
        ssq_ref[...] = sq

    @pl.when(t > 0)
    def _():
        ssum_ref[...] = ssum_ref[...] + s
        ssq_ref[...] = ssq_ref[...] + sq

    @pl.when(t == nt - 1)
    def _():
        # Fold conv bias into the stats:  y = z + b
        #   sum(y)   = sum(z) + n*b
        #   sum(y^2) = sum(z^2) + 2*b*sum(z) + n*b^2
        b = b_ref[...]                                        # (D, 1)
        s_all = ssum_ref[...]
        q_all = ssq_ref[...]
        sum_y = s_all + n_hw * b
        sum_y2 = q_all + 2.0 * b * s_all + n_hw * b * b
        # Group mean / E[y^2] broadcast back per channel via an indicator
        # "group averaging" matmul (ga[d,d'] = 1/(gsz*HW) if same group),
        # avoiding sublane-splitting reshapes.
        mean = jnp.dot(ga_ref[...], sum_y, preferred_element_type=jnp.float32)
        ey2 = jnp.dot(ga_ref[...], sum_y2, preferred_element_type=jnp.float32)
        var = jnp.maximum(ey2 - mean * mean, 0.0)             # biased var (GN)
        rstd = jax.lax.rsqrt(var + eps)
        scale = g_ref[...] * rstd
        shift = be_ref[...] + (b - mean) * scale
        # Normalize the full-precision z slab and emit bf16 (static unroll).
        for tt in range(n_tiles):
            sl = pl.ds(tt * tile, tile)
            o_ref[0, :, sl] = (z_ref[:, sl] * scale + shift).astype(o_ref.dtype)


# ----------------------------------------------------------------------------
# Pallas kernels 1a/1b (fallback for very large maps): two-pass GroupNorm with
# a bf16 intermediate (same structure as before, bf16 pre-cast operands).
# ----------------------------------------------------------------------------
def _proj_matmul_stats_kernel(x_ref, w_ref, y_ref, ssum_ref, ssq_ref):
    t = pl.program_id(1)
    z = jnp.dot(w_ref[...], x_ref[0], preferred_element_type=jnp.float32)  # (D, tile)
    y_ref[0] = z.astype(y_ref.dtype)

    s = jnp.sum(z, axis=1, keepdims=True)
    sq = jnp.sum(z * z, axis=1, keepdims=True)

    @pl.when(t == 0)
    def _():
        ssum_ref[0] = s
        ssq_ref[0] = sq

    @pl.when(t > 0)
    def _():
        ssum_ref[0] += s
        ssq_ref[0] += sq


def _proj_norm_kernel(y_ref, scale_ref, shift_ref, o_ref):
    z = y_ref[0].astype(jnp.float32)
    o_ref[0] = (z * scale_ref[0] + shift_ref[0]).astype(o_ref.dtype)


def _tile_plan(HW, tile_cap):
    t = max(128, (tile_cap // 128) * 128)
    if HW <= t:
        return HW, HW, 1
    hwp = _round_up(HW, t)
    return t, hwp, hwp // t


def _fused_vmem_bytes(Cin, D, tile, HWp, out_bytes):
    x_blk = 2 * Cin * tile * 2           # double-buffered bf16 input tile
    w_blk = 2 * D * Cin * 2              # resident bf16 weight (conservative x2)
    ga_blk = 2 * D * D * 4               # group averaging matrix
    z_slab = D * HWp * 4                 # f32 conv-output scratch slab
    o_blk = 2 * D * HWp * out_bytes      # resident output slab
    return x_blk + w_blk + ga_blk + z_slab + o_blk + 64 * 1024


def proj_groupnorm(x_bchw, w, b, gamma, beta, num_groups=32, eps=1e-5,
                   hw_tile=None, out_dtype=jnp.bfloat16):
    """1x1 conv (as matmul) + GroupNorm(32).

    Fast path: one fused pallas_call per level (no HBM intermediate).
    Fallback: two-call stats/normalize pipeline when the per-batch f32 slab
    would not fit the generation-aware VMEM budget.
    x_bchw: (B, Cin, H, W); w: (D, Cin); b/gamma/beta: (D,) -> (B, D, H, W).
    """
    B, Cin, H, W = x_bchw.shape
    D = w.shape[0]
    HW = H * W
    if hw_tile is None:
        hw_tile = 1024 if Cin <= 512 else 512     # bigger tiles for cheap levels
    x = x_bchw.reshape(B, Cin, HW).astype(jnp.bfloat16)       # pre-cast once
    wb = w.astype(jnp.bfloat16)
    out_bytes = jnp.dtype(out_dtype).itemsize
    budget = int(0.8 * _VMEM_LIMIT)

    # Largest lane-aligned HW tile whose fused working set fits VMEM (also
    # auto-shrinks the tile for very wide im2col inputs, e.g. Cin = 9*2048).
    plan = None
    t_try = max(128, (hw_tile // 128) * 128)
    while t_try >= 128:
        tile, HWp, T = _tile_plan(HW, t_try)
        if _fused_vmem_bytes(Cin, D, tile, HWp, out_bytes) <= budget:
            plan = (tile, HWp, T)
            break
        t_try -= 128

    if plan is not None:
        tile, HWp, T = plan
        xp = x if HWp == HW else jnp.pad(x, ((0, 0), (0, 0), (0, HWp - HW)))

        gsz = D // num_groups
        gid = jnp.arange(D) // gsz
        ga = (gid[:, None] == gid[None, :]).astype(jnp.float32) / float(gsz * HW)
        b_c = b.reshape(D, 1).astype(jnp.float32)
        g_c = gamma.reshape(D, 1).astype(jnp.float32)
        be_c = beta.reshape(D, 1).astype(jnp.float32)

        cost = pl.CostEstimate(
            flops=int(2 * B * D * Cin * HWp + 4 * B * D * D),
            transcendentals=int(B * D),
            bytes_accessed=int(B * Cin * HWp * 2 + D * Cin * 2 + D * D * 4
                               + B * D * HWp * out_bytes + 12 * D * 4))

        out = pl.pallas_call(
            partial(_proj_gn_fused_kernel, n_hw=float(HW), eps=float(eps)),
            out_shape=jax.ShapeDtypeStruct((B, D, HWp), out_dtype),
            grid=(B, T),
            in_specs=[
                pl.BlockSpec((1, Cin, tile), lambda bi, ti: (bi, 0, ti)),
                pl.BlockSpec((D, Cin), lambda bi, ti: (0, 0)),
                pl.BlockSpec((D, D), lambda bi, ti: (0, 0)),
                pl.BlockSpec((D, 1), lambda bi, ti: (0, 0)),
                pl.BlockSpec((D, 1), lambda bi, ti: (0, 0)),
                pl.BlockSpec((D, 1), lambda bi, ti: (0, 0)),
            ],
            out_specs=pl.BlockSpec((1, D, HWp), lambda bi, ti: (bi, 0, 0)),
            scratch_shapes=[pltpu.VMEM((D, HWp), jnp.float32),
                            pltpu.VMEM((D, 1), jnp.float32),
                            pltpu.VMEM((D, 1), jnp.float32)],
            compiler_params=pltpu.CompilerParams(
                dimension_semantics=("parallel", "arbitrary"),
                vmem_limit_bytes=_VMEM_LIMIT),
            cost_estimate=cost,
        )(xp, wb, ga, b_c, g_c, be_c)

        if HWp != HW:
            out = out[:, :, :HW]
        return out.reshape(B, D, H, W)

    # ---- fallback: two-pass path with bf16 intermediate (very large maps) ----
    # TODO(synk): K-tile the matmul (grid=(B,T,Kt) + f32 accumulator) so the
    # 9*Cin im2col level never needs this path on real image sizes.
    tile, HWp, T = _tile_plan(HW, hw_tile)
    xp = x if HWp == HW else jnp.pad(x, ((0, 0), (0, 0), (0, HWp - HW)))

    y, ssum, ssq = pl.pallas_call(
        _proj_matmul_stats_kernel,
        out_shape=(jax.ShapeDtypeStruct((B, D, HWp), jnp.bfloat16),
                   jax.ShapeDtypeStruct((B, D, 1), jnp.float32),
                   jax.ShapeDtypeStruct((B, D, 1), jnp.float32)),
        grid=(B, T),
        in_specs=[pl.BlockSpec((1, Cin, tile), lambda bi, ti: (bi, 0, ti)),
                  pl.BlockSpec((D, Cin), lambda bi, ti: (0, 0))],
        out_specs=(pl.BlockSpec((1, D, tile), lambda bi, ti: (bi, 0, ti)),
                   pl.BlockSpec((1, D, 1), lambda bi, ti: (bi, 0, 0)),
                   pl.BlockSpec((1, D, 1), lambda bi, ti: (bi, 0, 0))),
        compiler_params=pltpu.CompilerParams(
            dimension_semantics=("parallel", "arbitrary"),
            vmem_limit_bytes=_VMEM_LIMIT),
    )(xp, wb)

    gsz = D // num_groups
    n_hw = float(HW)
    s = ssum[..., 0]
    sq = ssq[..., 0]
    sum_y = s + n_hw * b[None, :]
    sum_y2 = sq + 2.0 * b[None, :] * s + n_hw * (b * b)[None, :]
    n_grp = float(gsz * HW)
    gm = sum_y.reshape(B, num_groups, gsz).sum(-1) / n_grp
    gm2 = sum_y2.reshape(B, num_groups, gsz).sum(-1) / n_grp
    var = jnp.maximum(gm2 - gm * gm, 0.0)
    rstd = jax.lax.rsqrt(var + eps)
    mean_d = jnp.repeat(gm, gsz, axis=1)
    rstd_d = jnp.repeat(rstd, gsz, axis=1)
    scale = (gamma[None, :] * rstd_d).reshape(B, D, 1)
    shift = (beta[None, :] + (b[None, :] - mean_d) * gamma[None, :] * rstd_d
             ).reshape(B, D, 1)

    out = pl.pallas_call(
        _proj_norm_kernel,
        out_shape=jax.ShapeDtypeStruct((B, D, HWp), out_dtype),
        grid=(B, T),
        in_specs=[pl.BlockSpec((1, D, tile), lambda bi, ti: (bi, 0, ti)),
                  pl.BlockSpec((1, D, 1), lambda bi, ti: (bi, 0, 0)),
                  pl.BlockSpec((1, D, 1), lambda bi, ti: (bi, 0, 0))],
        out_specs=pl.BlockSpec((1, D, tile), lambda bi, ti: (bi, 0, ti)),
        compiler_params=pltpu.CompilerParams(
            dimension_semantics=("parallel", "parallel"),
            vmem_limit_bytes=_VMEM_LIMIT),
    )(y, scale, shift)

    if HWp != HW:
        out = out[:, :, :HW]
    return out.reshape(B, D, H, W)


# ----------------------------------------------------------------------------
# Pallas kernel 2: per-decoder-layer detection heads, fused
#   class Linear + 3-layer bbox MLP + inverse_sigmoid(ref) add + sigmoid
# ----------------------------------------------------------------------------
def _heads_kernel(hs_ref, inv_ref, wc_ref, bc_ref,
                  w1_ref, b1_ref, w2_ref, b2_ref, w3_ref, b3_ref,
                  cls_ref, box_ref):
    hb = hs_ref[0]                                            # (BQ, D) bf16

    logits = jnp.dot(hb, wc_ref[0], preferred_element_type=jnp.float32) + bc_ref[0]
    cls_ref[0] = logits.astype(cls_ref.dtype)

    x = jnp.maximum(jnp.dot(hb, w1_ref[0],
                            preferred_element_type=jnp.float32) + b1_ref[0], 0.0)
    x = jnp.maximum(jnp.dot(x.astype(jnp.bfloat16), w2_ref[0],
                            preferred_element_type=jnp.float32) + b2_ref[0], 0.0)
    tmp = jnp.dot(x.astype(jnp.bfloat16), w3_ref[0],
                  preferred_element_type=jnp.float32) + b3_ref[0]      # (BQ, 128)

    # inverse_sigmoid(reference) is precomputed on the tiny (BQ, 2) tensor in
    # the wrapper; add it to the first two lanes only (iota mask), reproducing
    # `tmp[..., :2] += inverse_sigmoid(reference)` exactly.
    inv = inv_ref[0]                                          # (BQ, 2) f32
    col = jax.lax.broadcasted_iota(jnp.int32, tmp.shape, 1)
    off = (jnp.where(col == 0, inv[:, 0:1], 0.0)
           + jnp.where(col == 1, inv[:, 1:2], 0.0))
    box_ref[0] = jax.nn.sigmoid(tmp + off).astype(box_ref.dtype)


def detection_heads(hs, refs, wc, bc, w1, b1, w2, b2, w3, b3):
    """hs: (L,B,Q,D); refs: (L,B,Q,2). Returns (L,B,Q,C), (L,B,Q,4)."""
    L, B, Q, D = hs.shape
    C = wc.shape[-1]
    Qp = _round_up(Q, 16)                 # bf16 sublane-friendly M dimension
    Cp = _round_up(C, 128)                # lane-dense class output
    BOX = 128                             # lane-dense box output

    hs_p = jnp.pad(hs, ((0, 0), (0, 0), (0, Qp - Q), (0, 0))).astype(jnp.bfloat16)

    # inverse_sigmoid precomputed on the tiny reference tensor (PyTorch
    # clamp semantics); padded queries get 0 offset and are sliced off later.
    r = jnp.clip(refs.astype(jnp.float32), 0.0, 1.0)
    inv = jnp.log(jnp.maximum(r, 1e-5) / jnp.maximum(1.0 - r, 1e-5))
    inv_p = jnp.pad(inv, ((0, 0), (0, 0), (0, Qp - Q), (0, 0)))

    BQ = B * Qp
    hs2 = hs_p.reshape(L, BQ, D)
    inv2 = inv_p.reshape(L, BQ, 2)

    wc_p = jnp.pad(wc, ((0, 0), (0, 0), (0, Cp - C))).astype(jnp.bfloat16)
    bc_p = jnp.pad(bc, ((0, 0), (0, 0), (0, Cp - C)))
    w1b = w1.astype(jnp.bfloat16)
    w2b = w2.astype(jnp.bfloat16)
    w3_p = jnp.pad(w3, ((0, 0), (0, 0), (0, BOX - w3.shape[-1]))).astype(jnp.bfloat16)
    b3_p = jnp.pad(b3, ((0, 0), (0, 0), (0, BOX - b3.shape[-1])))

    cost = pl.CostEstimate(
        flops=int(2 * L * BQ * D * (Cp + 2 * D + BOX)),
        transcendentals=int(L * BQ * BOX),
        bytes_accessed=int(L * (BQ * D * 2 + D * (Cp + 2 * D + BOX) * 2
                                + (Cp + 2 * D + BOX) * 4 + BQ * 2 * 4
                                + BQ * (Cp + BOX) * 4)))

    cls, box = pl.pallas_call(
        _heads_kernel,
        out_shape=(jax.ShapeDtypeStruct((L, BQ, Cp), jnp.float32),
                   jax.ShapeDtypeStruct((L, BQ, BOX), jnp.float32)),
        grid=(L,),
        in_specs=[
            pl.BlockSpec((1, BQ, D), lambda l: (l, 0, 0)),
            pl.BlockSpec((1, BQ, 2), lambda l: (l, 0, 0)),
            pl.BlockSpec((1, D, Cp), lambda l: (l, 0, 0)),
            pl.BlockSpec((1, 1, Cp), lambda l: (l, 0, 0)),
            pl.BlockSpec((1, D, D), lambda l: (l, 0, 0)),
            pl.BlockSpec((1, 1, D), lambda l: (l, 0, 0)),
            pl.BlockSpec((1, D, D), lambda l: (l, 0, 0)),
            pl.BlockSpec((1, 1, D), lambda l: (l, 0, 0)),
            pl.BlockSpec((1, D, BOX), lambda l: (l, 0, 0)),
            pl.BlockSpec((1, 1, BOX), lambda l: (l, 0, 0)),
        ],
        out_specs=(pl.BlockSpec((1, BQ, Cp), lambda l: (l, 0, 0)),
                   pl.BlockSpec((1, BQ, BOX), lambda l: (l, 0, 0))),
        compiler_params=pltpu.CompilerParams(
            dimension_semantics=("parallel",),
            vmem_limit_bytes=_VMEM_LIMIT),
        cost_estimate=cost,
    )(hs2, inv2, wc_p, bc_p, w1b, b1, w2b, b2, w3_p, b3_p)

    cls = cls.reshape(L, B, Qp, Cp)[:, :, :Q, :C]
    box = box.reshape(L, B, Qp, BOX)[:, :, :Q, :4]
    return cls, box


# ----------------------------------------------------------------------------
# Glue / external-module stubs (plain JAX)
# ----------------------------------------------------------------------------
def im2col_3x3_s2_p1(x):
    """3x3 stride-2 pad-1 conv as im2col patches (B, C*9, Ho, Wo), bf16."""
    # TODO(synk): fully fusing this strided conv into the proj kernel needs
    # overlapping stride-2 input windows (manual DMA); im2col keeps the MXU
    # formulation and is emitted directly in bf16 to halve its HBM traffic.
    B, C, H, W = x.shape
    Ho, Wo = (H + 1) // 2, (W + 1) // 2
    xp = jnp.pad(x, ((0, 0), (0, 0), (1, 1), (1, 1)))
    cols = []
    for kh in range(3):
        for kw in range(3):
            cols.append(xp[:, :, kh:kh + 2 * (Ho - 1) + 1:2, kw:kw + 2 * (Wo - 1) + 1:2])
    patches = jnp.stack(cols, axis=2)                         # (B, C, 9, Ho, Wo)
    return patches.reshape(B, C * 9, Ho, Wo).astype(jnp.bfloat16), (Ho, Wo)


def torch_nearest_resize(x, out_hw):
    """F.interpolate(mode='nearest') index rule: floor(i * in / out)."""
    B, C, H, W = x.shape
    Ho, Wo = out_hw
    hi = (jnp.arange(Ho) * H) // Ho
    wi = (jnp.arange(Wo) * W) // Wo
    return x[:, :, hi][:, :, :, wi]


def backbone_stub(samples, bb_params):
    # TODO(synk): real ResNet backbone is an external module; replaced here by
    # deterministic avg-pool downsampling + 1x1 channel projection.
    img = samples[:, :3]
    mask = samples[:, 3:4]
    feats = []
    for (w, b, stride) in bb_params:
        B, _, H, W = img.shape
        Hs, Ws = H // stride, W // stride
        pooled = img.reshape(B, 3, Hs, stride, Ws, stride).mean(axis=(3, 5))
        src = jnp.einsum('oc,bchw->bohw', w, pooled) + b[None, :, None, None]
        m = mask[:, :, ::stride, ::stride]
        feats.append((src, m))
    return feats


def position_embedding_stub(not_mask, hidden_dim):
    # TODO(synk): PositionEmbeddingSine is an external module; minimal sine embedding here.
    nm = not_mask.astype(jnp.float32)                         # (B, H, W)
    y_embed = jnp.cumsum(nm, axis=1)
    x_embed = jnp.cumsum(nm, axis=2)
    num_pos_feats = hidden_dim // 2
    dim_t = jnp.arange(num_pos_feats, dtype=jnp.float32)
    dim_t = 10000.0 ** (2 * (dim_t // 2) / num_pos_feats)
    pos_x = x_embed[..., None] / dim_t
    pos_y = y_embed[..., None] / dim_t
    pos_x = jnp.stack([jnp.sin(pos_x[..., 0::2]), jnp.cos(pos_x[..., 1::2])],
                      axis=4).reshape(*pos_x.shape[:3], -1)
    pos_y = jnp.stack([jnp.sin(pos_y[..., 0::2]), jnp.cos(pos_y[..., 1::2])],
                      axis=4).reshape(*pos_y.shape[:3], -1)
    pos = jnp.concatenate([pos_y, pos_x], axis=3)             # (B, H, W, D)
    return jnp.transpose(pos, (0, 3, 1, 2))                   # (B, D, H, W)


def transformer_stub(srcs, masks, pos, query_embed, num_layers, ref_proj_w):
    # TODO(synk): the deformable transformer (multi-scale deformable attention) is an
    # external module with data-dependent sampling; replaced by a deterministic mixer.
    B = srcs[0].shape[0]
    Q = query_embed.shape[0]
    D = query_embed.shape[1] // 2
    flat = jnp.concatenate([(s.astype(jnp.float32) + p).reshape(B, D, -1)
                            for s, p in zip(srcs, pos)], axis=-1)
    ctx = flat.mean(axis=-1)                                  # (B, D)
    q_pos, q_tgt = query_embed[:, :D], query_embed[:, D:]
    init_reference = jnp.broadcast_to(jax.nn.sigmoid(q_pos @ ref_proj_w)[None], (B, Q, 2))
    h = jnp.tanh(q_tgt[None, :, :] + ctx[:, None, :])
    layers = []
    for l in range(num_layers):
        h = jnp.tanh(h + 0.5 * ctx[:, None, :] + 0.1 * (l + 1) * q_pos[None, :, :])
        layers.append(h)
    hs = jnp.stack(layers)                                    # (L, B, Q, D)
    inter_references = jax.nn.sigmoid(hs[:-1, ..., :2])       # (L-1, B, Q, 2)
    return hs, init_reference, inter_references


# ----------------------------------------------------------------------------
# DeformableDETR forward (Pallas-backed hot paths)
# ----------------------------------------------------------------------------
def deformable_detr_forward(samples, p):
    hidden_dim = p['hidden_dim']
    nfl = p['num_feature_levels']
    aux_loss = p['aux_loss']
    hw_tile = p.get('hw_tile')

    features = backbone_stub(samples, p['backbone'])
    srcs, masks = [], []
    for level, (src, m) in enumerate(features):
        mask = (m[:, 0] != 0)                                 # feat[1].float()[:, 0].bool()
        w, b, g, be = p['input_proj'][level]
        srcs.append(proj_groupnorm(src, w, b, g, be, hw_tile=hw_tile))     # Pallas kernel 1
        masks.append(mask)

    if nfl > len(srcs):
        _len = len(srcs)
        for li in range(_len, nfl):
            base = features[-1][0] if li == _len else srcs[-1]
            w, b, g, be = p['input_proj'][li]
            patches, (Ho, Wo) = im2col_3x3_s2_p1(base)        # 3x3 s2 conv -> matmul
            src = proj_groupnorm(patches, w, b, g, be, hw_tile=hw_tile)    # Pallas kernel 1
            srcs.append(src)
            m = samples[:, 3:4]
            mask = torch_nearest_resize(m, (Ho, Wo)) != 0
            masks.append(mask[:, 0])

    pos = [position_embedding_stub(~mask, hidden_dim) for mask in masks]

    query_embeds = p['query_embed']
    hs, init_reference, inter_references = transformer_stub(
        srcs, masks, pos, query_embeds, p['num_decoder_layers'], p['ref_proj_w'])

    # reference per decoder layer: lvl==0 -> init, else inter_references[lvl-1]
    refs = jnp.concatenate([init_reference[None], inter_references], axis=0)   # (L,B,Q,2)

    outputs_class, outputs_coord = detection_heads(                            # Pallas kernel 2
        hs, refs,
        p['wc'], p['bc'], p['w1'], p['b1'], p['w2'], p['b2'], p['w3'], p['b3'])

    out = {'pred_logits': outputs_class[-1], 'pred_boxes': outputs_coord[-1]}
    if aux_loss:
        out['aux_outputs'] = [{'pred_logits': a, 'pred_boxes': bx}
                              for a, bx in zip(outputs_class[:-1], outputs_coord[:-1])]
    return out


# ----------------------------------------------------------------------------
# Deterministic parameter construction
# ----------------------------------------------------------------------------
def init_params(key, *, hidden_dim, num_classes, num_queries, num_decoder_layers,
                num_feature_levels, backbone_channels, backbone_strides, hw_tile=None):
    ks = iter(jax.random.split(key, 64))
    D, L = hidden_dim, num_decoder_layers
    p = {'hidden_dim': D, 'num_feature_levels': num_feature_levels,
         'num_decoder_layers': L, 'aux_loss': True, 'hw_tile': hw_tile}

    p['backbone'] = []
    for c, s in zip(backbone_channels, backbone_strides):
        w = jax.random.normal(next(ks), (c, 3), jnp.float32) * 0.2
        b = jax.random.normal(next(ks), (c,), jnp.float32) * 0.02
        p['backbone'].append((w, b, s))

    proj = []
    for c in backbone_channels:                               # 1x1 conv levels
        w = jax.random.normal(next(ks), (D, c), jnp.float32) * (1.0 / math.sqrt(c))
        proj.append((w, jnp.zeros((D,)), jnp.ones((D,)), jnp.zeros((D,))))
    c = backbone_channels[-1]                                 # extra: 3x3 s2 conv (flattened)
    for _ in range(num_feature_levels - len(backbone_channels)):
        w = jax.random.normal(next(ks), (D, c * 9), jnp.float32) * (1.0 / math.sqrt(c * 9))
        proj.append((w, jnp.zeros((D,)), jnp.ones((D,)), jnp.zeros((D,))))
        c = D
    p['input_proj'] = proj

    p['query_embed'] = jax.random.normal(next(ks), (num_queries, 2 * D), jnp.float32)
    p['ref_proj_w'] = jax.random.normal(next(ks), (D, 2), jnp.float32) * 0.1

    bias_value = -math.log((1 - 0.01) / 0.01)
    p['wc'] = jax.random.normal(next(ks), (L, D, num_classes), jnp.float32) * 0.05
    p['bc'] = jnp.full((L, 1, num_classes), bias_value, jnp.float32)
    p['w1'] = jax.random.normal(next(ks), (L, D, D), jnp.float32) * 0.05
    p['b1'] = jnp.zeros((L, 1, D), jnp.float32)
    p['w2'] = jax.random.normal(next(ks), (L, D, D), jnp.float32) * 0.05
    p['b2'] = jnp.zeros((L, 1, D), jnp.float32)
    p['w3'] = jax.random.normal(next(ks), (L, D, 4), jnp.float32) * 0.05
    # with_box_refine=True: only bbox_embed[0]'s bias[2:] gets -2.0 (as in PyTorch init).
    b3 = jnp.zeros((L, 1, 4), jnp.float32).at[0, 0, 2:].set(-2.0)
    p['b3'] = b3
    return p


if __name__ == "__main__":
    key = jax.random.PRNGKey(0)
    k_img, k_mask, k_par = jax.random.split(key, 3)

    # Small but non-trivial shapes: the stride-4 level has HW=400, which with
    # hw_tile=128 exercises the multi-tile + zero-padded-tail fused GroupNorm path.
    B, H, W = 2, 80, 80
    hidden_dim, num_classes, num_queries = 64, 7, 8
    num_decoder_layers, num_feature_levels = 2, 3
    backbone_channels, backbone_strides = [8, 16], [4, 8]

    img = jax.random.normal(k_img, (B, 3, H, W), jnp.float32)
    pad_mask = (jax.random.uniform(k_mask, (B, 1, H, W)) > 0.7).astype(jnp.float32)
    samples = jnp.concatenate([img, pad_mask], axis=1)        # (B, 4, H, W): RGB + mask channel

    params = init_params(k_par, hidden_dim=hidden_dim, num_classes=num_classes,
                         num_queries=num_queries, num_decoder_layers=num_decoder_layers,
                         num_feature_levels=num_feature_levels,
                         backbone_channels=backbone_channels,
                         backbone_strides=backbone_strides,
                         hw_tile=128)

    out = deformable_detr_forward(samples, params)
    jax.block_until_ready(out['pred_logits'])
    jax.block_until_ready(out['pred_boxes'])
    assert out['pred_logits'].shape == (B, num_queries, num_classes)
    assert out['pred_boxes'].shape == (B, num_queries, 4)
    assert len(out['aux_outputs']) == num_decoder_layers - 1
    print("KERNEL_OK")
</pallas_src>

<mosaic_0001>
module attributes {stable_mosaic.version = 11 : i64} {
  func.func @_proj_gn_fused_kernel(%arg0: i32, %arg1: i32, %arg2: memref<1x8x128xbf16, #tpu.memory_space<vmem>>, %arg3: memref<64x8xbf16, #tpu.memory_space<vmem>>, %arg4: memref<64x64xf32, #tpu.memory_space<vmem>>, %arg5: memref<64x1xf32, #tpu.memory_space<vmem>>, %arg6: memref<64x1xf32, #tpu.memory_space<vmem>>, %arg7: memref<64x1xf32, #tpu.memory_space<vmem>>, %arg8: memref<1x64x512xbf16, #tpu.memory_space<vmem>>, %arg9: memref<64x512xf32, #tpu.memory_space<vmem>>, %arg10: memref<64x1xf32, #tpu.memory_space<vmem>>, %arg11: memref<64x1xf32, #tpu.memory_space<vmem>>) attributes {dimension_semantics = [#tpu.dimension_semantics<parallel>, #tpu.dimension_semantics<arbitrary>], iteration_bounds = array<i64: 2, 4>, scalar_prefetch = 0 : i64, scratch_operands = 3 : i64, tpu.core_type = #tpu.core_type<tc>, window_params = [{transform_indices = @transform_0, window_bounds = array<i64: 1, 8, 128>}, {pipeline_mode = #tpu.pipeline_mode<synchronous>, transform_indices = @transform_1, window_bounds = array<i64: 64, 8>}, {pipeline_mode = #tpu.pipeline_mode<synchronous>, transform_indices = @transform_2, window_bounds = array<i64: 64, 64>}, {pipeline_mode = #tpu.pipeline_mode<synchronous>, transform_indices = @transform_3, window_bounds = array<i64: 64, 1>}, {pipeline_mode = #tpu.pipeline_mode<synchronous>, transform_indices = @transform_4, window_bounds = array<i64: 64, 1>}, {pipeline_mode = #tpu.pipeline_mode<synchronous>, transform_indices = @transform_5, window_bounds = array<i64: 64, 1>}, {transform_indices = @transform_6, window_bounds = array<i64: 1, 64, 512>}]} {
    %c0 = arith.constant 0 : index
    %c0_0 = arith.constant 0 : index
    %0 = vector.load %arg3[%c0, %c0_0] : memref<64x8xbf16, #tpu.memory_space<vmem>>, vector<64x8xbf16>
    %c0_1 = arith.constant 0 : index
    %c0_2 = arith.constant 0 : index
    %c0_3 = arith.constant 0 : index
    %1 = vector.load %arg2[%c0_1, %c0_2, %c0_3] : memref<1x8x128xbf16, #tpu.memory_space<vmem>>, vector<1x8x128xbf16>
    %2 = vector.shape_cast %1 : vector<1x8x128xbf16> to vector<8x128xbf16>
    %cst = arith.constant dense<0.000000e+00> : vector<64x128xf32>
    %3 = tpu.matmul %0, %2, %cst {dimension_numbers = #tpu.dot_dimension_numbers<[1], [0], [0], [1], [0, 0, 1, 1], [], []>} : vector<64x8xbf16>, vector<8x128xbf16>, vector<64x128xf32> -> vector<64x128xf32>
    %c128_i32 = arith.constant 128 : i32
    %4 = arith.muli %arg1, %c128_i32 : i32
    %5 = tpu.assume_multiple %4, 128 : i32
    %c0_4 = arith.constant 0 : index
    %6 = arith.index_cast %5 : i32 to index
    %7 = vector.load %arg9[%c0_4, %6] : memref<64x512xf32, #tpu.memory_space<vmem>>, vector<64x128xf32>
    tpu.vector_store %arg9[%c0_4, %6], %3 {strides = array<i32>} : memref<64x512xf32, #tpu.memory_space<vmem>>, vector<64x128xf32>,
    %cst_5 = arith.constant dense<0.000000e+00> : vector<64xf32>
    %8 = vector.multi_reduction <add>, %3, %cst_5 [1] : vector<64x128xf32> to vector<64xf32>
    %9 = vector.shape_cast %8 : vector<64xf32> to vector<64x1xf32>
    %10 = arith.mulf %3, %3 : vector<64x128xf32>
    %cst_6 = arith.constant dense<0.000000e+00> : vector<64xf32>
    %11 = vector.multi_reduction <add>, %10, %cst_6 [1] : vector<64x128xf32> to vector<64xf32>
    %12 = vector.shape_cast %11 : vector<64xf32> to vector<64x1xf32>
    %c0_i32 = arith.constant 0 : i32
    %13 = arith.cmpi eq, %arg1, %c0_i32 : i32
    %14 = arith.extui %13 : i1 to i32
    %c0_i32_7 = arith.constant 0 : i32
    %15 = arith.cmpi ne, %14, %c0_i32_7 : i32
    scf.if %15 {
      %c0_11 = arith.constant 0 : index
      %c0_12 = arith.constant 0 : index
      %22 = vector.load %arg10[%c0_11, %c0_12] : memref<64x1xf32, #tpu.memory_space<vmem>>, vector<64x1xf32>
      tpu.vector_store %arg10[%c0_11, %c0_12], %9 {strides = array<i32>} : memref<64x1xf32, #tpu.memory_space<vmem>>, vector<64x1xf32>,
      %c0_13 = arith.constant 0 : index
      %c0_14 = arith.constant 0 : index
      %23 = vector.load %arg11[%c0_13, %c0_14] : memref<64x1xf32, #tpu.memory_space<vmem>>, vector<64x1xf32>
      tpu.vector_store %arg11[%c0_13, %c0_14], %12 {strides = array<i32>} : memref<64x1xf32, #tpu.memory_space<vmem>>, vector<64x1xf32>,
    } else {
    }
    %c0_i32_8 = arith.constant 0 : i32
    %16 = arith.cmpi sgt, %arg1, %c0_i32_8 : i32
    %17 = arith.extui %16 : i1 to i32
    %c0_i32_9 = arith.constant 0 : i32
    %18 = arith.cmpi ne, %17, %c0_i32_9 : i32
    scf.if %18 {
      %c0_11 = arith.constant 0 : index
      %c0_12 = arith.constant 0 : index
      %22 = vector.load %arg10[%c0_11, %c0_12] : memref<64x1xf32, #tpu.memory_space<vmem>>, vector<64x1xf32>
      %23 = arith.addf %22, %9 : vector<64x1xf32>
      %c0_13 = arith.constant 0 : index
      %c0_14 = arith.constant 0 : index
      %24 = vector.load %arg10[%c0_13, %c0_14] : memref<64x1xf32, #tpu.memory_space<vmem>>, vector<64x1xf32>
      tpu.vector_store %arg10[%c0_13, %c0_14], %23 {strides = array<i32>} : memref<64x1xf32, #tpu.memory_space<vmem>>, vector<64x1xf32>,
      %c0_15 = arith.constant 0 : index
      %c0_16 = arith.constant 0 : index
      %25 = vector.load %arg11[%c0_15, %c0_16] : memref<64x1xf32, #tpu.memory_space<vmem>>, vector<64x1xf32>
      %26 = arith.addf %25, %12 : vector<64x1xf32>
      %c0_17 = arith.constant 0 : index
      %c0_18 = arith.constant 0 : index
      %27 = vector.load %arg11[%c0_17, %c0_18] : memref<64x1xf32, #tpu.memory_space<vmem>>, vector<64x1xf32>
      tpu.vector_store %arg11[%c0_17, %c0_18], %26 {strides = array<i32>} : memref<64x1xf32, #tpu.memory_space<vmem>>, vector<64x1xf32>,
    } else {
    }
    %c3_i32 = arith.constant 3 : i32
    %19 = arith.cmpi eq, %arg1, %c3_i32 : i32
    %20 = arith.extui %19 : i1 to i32
    %c0_i32_10 = arith.constant 0 : i32
    %21 = arith.cmpi ne, %20, %c0_i32_10 : i32
    scf.if %21 {
      %c0_11 = arith.constant 0 : index
      %c0_12 = arith.constant 0 : index
      %22 = vector.load %arg5[%c0_11, %c0_12] : memref<64x1xf32, #tpu.memory_space<vmem>>, vector<64x1xf32>
      %c0_13 = arith.constant 0 : index
      %c0_14 = arith.constant 0 : index
      %23 = vector.load %arg10[%c0_13, %c0_14] : memref<64x1xf32, #tpu.memory_space<vmem>>, vector<64x1xf32>
      %c0_15 = arith.constant 0 : index
      %c0_16 = arith.constant 0 : index
      %24 = vector.load %arg11[%c0_15, %c0_16] : memref<64x1xf32, #tpu.memory_space<vmem>>, vector<64x1xf32>
      %cst_17 = arith.constant 4.000000e+02 : f32
      %25 = vector.broadcast %cst_17 : f32 to vector<64x1xf32>
      %26 = arith.mulf %25, %22 : vector<64x1xf32>
      %27 = arith.addf %23, %26 : vector<64x1xf32>
      %cst_18 = arith.constant 2.000000e+00 : f32
      %28 = vector.broadcast %cst_18 : f32 to vector<64x1xf32>
      %29 = arith.mulf %28, %22 : vector<64x1xf32>
      %30 = arith.mulf %29, %23 : vector<64x1xf32>
      %31 = arith.addf %24, %30 : vector<64x1xf32>
      %cst_19 = arith.constant 4.000000e+02 : f32
      %32 = vector.broadcast %cst_19 : f32 to vector<64x1xf32>
      %33 = arith.mulf %32, %22 : vector<64x1xf32>
      %34 = arith.mulf %33, %22 : vector<64x1xf32>
      %35 = arith.addf %31, %34 : vector<64x1xf32>
      %c0_20 = arith.constant 0 : index
      %c0_21 = arith.constant 0 : index
      %36 = vector.load %arg4[%c0_20, %c0_21] : memref<64x64xf32, #tpu.memory_space<vmem>>, vector<64x64xf32>
      %cst_22 = arith.constant dense<0.000000e+00> : vector<64x1xf32>
      %37 = tpu.matmul %36, %27, %cst_22 {dimension_numbers = #tpu.dot_dimension_numbers<[1], [0], [0], [1], [0, 0, 1, 1], [], []>} : vector<64x64xf32>, vector<64x1xf32>, vector<64x1xf32> -> vector<64x1xf32>
      %c0_23 = arith.constant 0 : index
      %c0_24 = arith.constant 0 : index
      %38 = vector.load %arg4[%c0_23, %c0_24] : memref<64x64xf32, #tpu.memory_space<vmem>>, vector<64x64xf32>
      %cst_25 = arith.constant dense<0.000000e+00> : vector<64x1xf32>
      %39 = tpu.matmul %38, %35, %cst_25 {dimension_numbers = #tpu.dot_dimension_numbers<[1], [0], [0], [1], [0, 0, 1, 1], [], []>} : vector<64x64xf32>, vector<64x1xf32>, vector<64x1xf32> -> vector<64x1xf32>
      %40 = arith.mulf %37, %37 : vector<64x1xf32>
      %41 = arith.subf %39, %40 : vector<64x1xf32>
      %cst_26 = arith.constant 0.000000e+00 : f32
      %42 = vector.broadcast %cst_26 : f32 to vector<64x1xf32>
      %43 = arith.maximumf %41, %42 : vector<64x1xf32>
      %cst_27 = arith.constant 9.99999974E-6 : f32
      %44 = vector.broadcast %cst_27 : f32 to vector<64x1xf32>
      %45 = arith.addf %43, %44 : vector<64x1xf32>
      %46 = math.rsqrt %45 : vector<64x1xf32>
      %c0_28 = arith.constant 0 : index
      %c0_29 = arith.constant 0 : index
      %47 = vector.load %arg6[%c0_28, %c0_29] : memref<64x1xf32, #tpu.memory_space<vmem>>, vector<64x1xf32>
      %48 = arith.mulf %47, %46 : vector<64x1xf32>
      %c0_30 = arith.constant 0 : index
      %c0_31 = arith.constant 0 : index
      %49 = vector.load %arg7[%c0_30, %c0_31] : memref<64x1xf32, #tpu.memory_space<vmem>>, vector<64x1xf32>
      %50 = arith.subf %22, %37 : vector<64x1xf32>
      %51 = arith.mulf %50, %48 : vector<64x1xf32>
      %52 = arith.addf %49, %51 : vector<64x1xf32>
      %c0_32 = arith.constant 0 : index
      %c0_33 = arith.constant 0 : index
      %53 = vector.load %arg9[%c0_32, %c0_33] : memref<64x512xf32, #tpu.memory_space<vmem>>, vector<64x128xf32>
      %54 = vector.broadcast %48 : vector<64x1xf32> to vector<64x128xf32>
      %55 = arith.mulf %53, %54 : vector<64x128xf32>
      %56 = vector.broadcast %52 : vector<64x1xf32> to vector<64x128xf32>
      %57 = arith.addf %55, %56 : vector<64x128xf32>
      %58 = arith.truncf %57 : vector<64x128xf32> to vector<64x128xbf16>
      %c0_34 = arith.constant 0 : index
      %c0_35 = arith.constant 0 : index
      %c0_36 = arith.constant 0 : index
      %59 = vector.load %arg8[%c0_34, %c0_35, %c0_36] : memref<1x64x512xbf16, #tpu.memory_space<vmem>>, vector<1x64x128xbf16>
      %60 = vector.shape_cast %59 : vector<1x64x128xbf16> to vector<64x128xbf16>
      %61 = vector.shape_cast %58 : vector<64x128xbf16> to vector<1x64x128xbf16>
      tpu.vector_store %arg8[%c0_34, %c0_35, %c0_36], %61 {strides = array<i32>} : memref<1x64x512xbf16, #tpu.memory_space<vmem>>, vector<1x64x128xbf16>,
      %c0_37 = arith.constant 0 : index
      %c128 = arith.constant 128 : index
      %62 = vector.load %arg9[%c0_37, %c128] : memref<64x512xf32, #tpu.memory_space<vmem>>, vector<64x128xf32>
      %63 = vector.broadcast %48 : vector<64x1xf32> to vector<64x128xf32>
      %64 = arith.mulf %62, %63 : vector<64x128xf32>
      %65 = vector.broadcast %52 : vector<64x1xf32> to vector<64x128xf32>
      %66 = arith.addf %64, %65 : vector<64x128xf32>
      %67 = arith.truncf %66 : vector<64x128xf32> to vector<64x128xbf16>
      %c0_38 = arith.constant 0 : index
      %c0_39 = arith.constant 0 : index
      %c128_40 = arith.constant 128 : index
      %68 = vector.load %arg8[%c0_38, %c0_39, %c128_40] : memref<1x64x512xbf16, #tpu.memory_space<vmem>>, vector<1x64x128xbf16>
      %69 = vector.shape_cast %68 : vector<1x64x128xbf16> to vector<64x128xbf16>
      %70 = vector.shape_cast %67 : vector<64x128xbf16> to vector<1x64x128xbf16>
      tpu.vector_store %arg8[%c0_38, %c0_39, %c128_40], %70 {strides = array<i32>} : memref<1x64x512xbf16, #tpu.memory_space<vmem>>, vector<1x64x128xbf16>,
      %c0_41 = arith.constant 0 : index
      %c256 = arith.constant 256 : index
      %71 = vector.load %arg9[%c0_41, %c256] : memref<64x512xf32, #tpu.memory_space<vmem>>, vector<64x128xf32>
      %72 = vector.broadcast %48 : vector<64x1xf32> to vector<64x128xf32>
      %73 = arith.mulf %71, %72 : vector<64x128xf32>
      %74 = vector.broadcast %52 : vector<64x1xf32> to vector<64x128xf32>
      %75 = arith.addf %73, %74 : vector<64x128xf32>
      %76 = arith.truncf %75 : vector<64x128xf32> to vector<64x128xbf16>
      %c0_42 = arith.constant 0 : index
      %c0_43 = arith.constant 0 : index
      %c256_44 = arith.constant 256 : index
      %77 = vector.load %arg8[%c0_42, %c0_43, %c256_44] : memref<1x64x512xbf16, #tpu.memory_space<vmem>>, vector<1x64x128xbf16>
      %78 = vector.shape_cast %77 : vector<1x64x128xbf16> to vector<64x128xbf16>
      %79 = vector.shape_cast %76 : vector<64x128xbf16> to vector<1x64x128xbf16>
      tpu.vector_store %arg8[%c0_42, %c0_43, %c256_44], %79 {strides = array<i32>} : memref<1x64x512xbf16, #tpu.memory_space<vmem>>, vector<1x64x128xbf16>,
      %c0_45 = arith.constant 0 : index
      %c384 = arith.constant 384 : index
      %80 = vector.load %arg9[%c0_45, %c384] : memref<64x512xf32, #tpu.memory_space<vmem>>, vector<64x128xf32>
      %81 = vector.broadcast %48 : vector<64x1xf32> to vector<64x128xf32>
      %82 = arith.mulf %80, %81 : vector<64x128xf32>
      %83 = vector.broadcast %52 : vector<64x1xf32> to vector<64x128xf32>
      %84 = arith.addf %82, %83 : vector<64x128xf32>
      %85 = arith.truncf %84 : vector<64x128xf32> to vector<64x128xbf16>
      %c0_46 = arith.constant 0 : index
      %c0_47 = arith.constant 0 : index
      %c384_48 = arith.constant 384 : index
      %86 = vector.load %arg8[%c0_46, %c0_47, %c384_48] : memref<1x64x512xbf16, #tpu.memory_space<vmem>>, vector<1x64x128xbf16>
      %87 = vector.shape_cast %86 : vector<1x64x128xbf16> to vector<64x128xbf16>
      %88 = vector.shape_cast %85 : vector<64x128xbf16> to vector<1x64x128xbf16>
      tpu.vector_store %arg8[%c0_46, %c0_47, %c384_48], %88 {strides = array<i32>} : memref<1x64x512xbf16, #tpu.memory_space<vmem>>, vector<1x64x128xbf16>,
    } else {
    }
    return
  }
  func.func @transform_0(%arg0: i32, %arg1: i32) -> (i32, i32, i32) {
    %c0_i32 = arith.constant 0 : i32
    %c0_i32_0 = arith.constant 0 : i32
    return %arg0, %c0_i32, %arg1 : i32, i32, i32
  }
  func.func @transform_1(%arg0: i32, %arg1: i32) -> (i32, i32) {
    %c0_i32 = arith.constant 0 : i32
    %c0_i32_0 = arith.constant 0 : i32
    %c0_i32_1 = arith.constant 0 : i32
    return %c0_i32, %c0_i32_0 : i32, i32
  }
  func.func @transform_2(%arg0: i32, %arg1: i32) -> (i32, i32) {
    %c0_i32 = arith.constant 0 : i32
    %c0_i32_0 = arith.constant 0 : i32
    %c0_i32_1 = arith.constant 0 : i32
    return %c0_i32, %c0_i32_0 : i32, i32
  }
  func.func @transform_3(%arg0: i32, %arg1: i32) -> (i32, i32) {
    %c0_i32 = arith.constant 0 : i32
    %c0_i32_0 = arith.constant 0 : i32
    %c0_i32_1 = arith.constant 0 : i32
    return %c0_i32, %c0_i32_0 : i32, i32
  }
  func.func @transform_4(%arg0: i32, %arg1: i32) -> (i32, i32) {
    %c0_i32 = arith.constant 0 : i32
    %c0_i32_0 = arith.constant 0 : i32
    %c0_i32_1 = arith.constant 0 : i32
    return %c0_i32, %c0_i32_0 : i32, i32
  }
  func.func @transform_5(%arg0: i32, %arg1: i32) -> (i32, i32) {
    %c0_i32 = arith.constant 0 : i32
    %c0_i32_0 = arith.constant 0 : i32
    %c0_i32_1 = arith.constant 0 : i32
    return %c0_i32, %c0_i32_0 : i32, i32
  }
  func.func @transform_6(%arg0: i32, %arg1: i32) -> (i32, i32, i32) {
    %c0_i32 = arith.constant 0 : i32
    %c0_i32_0 = arith.constant 0 : i32
    %c0_i32_1 = arith.constant 0 : i32
    return %arg0, %c0_i32, %c0_i32_0 : i32, i32, i32
  }
}

</mosaic_0001>

<bundles_post_ra>
// kernel: tpu_custom_call.1
= control target key start
LH: loop header
LB: loop body
LE: loop exit
PB: predicated region body
PF: predicated region fallthrough
CT: control target
= control target key end

     0   :  { %11 = vsyncpa [#allocation6], 0  ;;  %s2282_s0 = inlined_call_operand.vmem [shape: bf16[2,8,512], index: 0, kind: input, shape index: {}]   ;;  %s2283_s1 = inlined_call_operand.vmem [shape: bf16[64,8], index: 1, kind: input, shape index: {}]   ;;  %s2284_s2 = inlined_call_operand.vmem [shape: f32[64,64], index: 2, kind: input, shape index: {}]   ;;  %s2285_s3 = inlined_call_operand.vmem [shape: f32[64,1], index: 3, kind: input, shape index: {}]   ;;  %s2286_s4 = inlined_call_operand.vmem [shape: f32[64,1], index: 4, kind: input, shape index: {}]   ;;  %s2287_s5 = inlined_call_operand.vmem [shape: f32[64,1], index: 5, kind: input, shape index: {}]   ;;  %s2288_s6 = inlined_call_operand.hbm [shape: bf16[2,64,512], index: 6, kind: output, shape index: {}]  }
   0x1   :  { %13 = vsyncpa [#allocation6 + $0x1], 0  ;;  %s1835_s21 = smov 0   ;;  %s1837_s22 = smov 0  }
   0x2   :  { %s1839_s23 = smov 0   ;;  %s1841_s24 = smov 0  }
   0x3   :  { %s1843_s25 = smov 0   ;;  %s1845_s26 = smov 0  }
   0x4   :  { %s1847_s27 = smov 0   ;;  %s1849_s28 = smov 0  }
   0x5 LB: > { %s1358_s29 = sadd.s32 4294967295, %s1794_s28   ;;  %s1359_s30 = sadd.s32 4294967294, %s1794_s28   ;;  %s1794_s28 = sphi %s1849_s28, %s19_s28   ;;  %s1790_s27 = sphi %s1847_s27, %s2304_s27   ;;  %s1786_s26 = sphi %s1845_s26, %s2303_s26   ;;  %s1782_s25 = sphi %s1843_s25, %s2302_s25   ;;  %s1778_s24 = sphi %s1841_s24, %s2301_s24   ;;  %s1774_s23 = sphi %s1839_s23, %s2300_s23   ;;  %s1770_s22 = sphi %s1837_s22, %s2299_s22   ;;  %s1766_s21 = sphi %s1835_s21, %s2298_s21  }
   0x6   : > { %s28_s7 = sadd.s32 1, %s1786_s26  ;;  %s31_s8 = sadd.s32 1, %s1790_s27 }
   0x7   : > { %p29_p0 = scmp.ge.s32.totalorder %s28_s7, 4  ;;  %p181_p1 = scmp.ne.s32.totalorder %s1774_s23, %s1770_s22 }
   0x8   : > { %p182_p2 = scmp.eq.s32.totalorder %s1358_s29, 7  ;;  %p187_p4 = scmp.ne.s32.totalorder %s1770_s22, %s1766_s21 }
   0x9   : > { %s2306_s7 = smov (%p29_p0, %s28_s7), 0  ;;  %s2308_s8 = smov (!%p29_p0, %s31_s8), %s1790_s27 }
   0xa   : > { %2291 = sst [smem:[#allocation8_spill]] %s2306_s7  ;;  %p1884_p3 = por %p182_p2, %p181_p1 }
   0xb   : > { %p33_p5 = scmp.ge.s32.totalorder %s2308_s8, 2  ;;  %p188_p6 = scmp.eq.s32.totalorder %s1359_s30, 7 }
   0xc   : > { %p1362_p7 = scmp.ge.s32.totalorder %s1794_s28, 1  ;;  %p232_p8 = scmp.lt.s32.totalorder %s1794_s28, 9 }
   0xd   : > { %s2310_s8 = smov (%p33_p5, %s2308_s8), 0  ;;  %p1894_p9 = por %p188_p6, %p187_p4 }
   0xe   : > { %2293 = sst [smem:[#allocation9_spill]] %s2310_s8  ;;  %p233_p10 = pnand %p1362_p7, %p232_p8 }
   0xf   : > { %s168_s11 = ssub.s32 %s1790_s27, %s2310_s8  ;;  %s171_s12 = sadd.s32 1, %s1774_s23  ;;  %v1678_v0 = vld [vmem:[%s2283_s1] sm:$0xff] (!%p233_p10)   ;;  %vm303_vm0 = vcmask (!%p233_p10), 64512   ;;  %v1679_v1 = vld [vmem:[%s2283_s1 + $0x10] sm:$0xff] (!%p233_p10)   ;;  %vm316_vm1 = vcmask (!%p233_p10), 1043456   ;;  %v1680_v4 = vld [vmem:[%s2283_s1 + $0x8] sm:$0xff] (!%p233_p10)  }
  0x10   : > { %p169_p11 = scmp.eq.s32.totalorder %s168_s11, 0  ;;  %236 = sbr.rel (%p233_p10) target bundleno = 882 (0x372), region = 44  ;;  %1504 = vmatprep.mubr.msk.bf16.mxu0 (!%p233_p10), %vm303_vm0, %v1678_v0  ;;  %1508 = vmatprep.mubr.msk.bf16.mxu1 (!%p233_p10), %vm303_vm0, %v1679_v1  ;;  %v1681_v5 = vld [vmem:[%s2283_s1 + $0x18] sm:$0xff] (!%p233_p10)  }
  0x11   : > { %s2289_s14 = sand.u32 (!%p233_p10), 1, %s1770_s22   ;;  %p265_p12 = scmp.lt.s32.totalorder (!%p233_p10), %s1782_s25, 1 }
  0x12   : > { %s1902_s13 = scalar_select %p169_p11, %s1774_s23, %s171_s12  }
  0x13   : > { %s1911_s17 = sshll.u32 (!%p233_p10), %s2289_s14, 7  ;;  %p267_p13 = scmp.lt.s32.totalorder (!%p233_p10), %s1778_s24, 3 }
  0x14   : > { %s1942_s7 = scalar_lea.vmem (!%p233_p10), [#allocation5], %s1911_s17  ;;  %p1376_p0 = scmp.ne.s32.totalorder (!%p233_p10), %s1778_s24, 0 }
  0x17   : > { %s266_s20 = scalar_select %p265_p12, %s1782_s25, 1 }
  0x18   : > { %s268_s29 = scalar_select %p267_p13, %s1778_s24, 3 }
  0x19   : > { %s1364_s30 = sshll.u32 %s266_s20, 2  ;;  %s1374_s20 = sshll.u32 %s1778_s24, 7  ;;  %vm442_vm2 = vcmask (!%p1376_p0), 7168  }
  0x1a   : > { %s270_s11 = sadd.s32 %s1364_s30, %s268_s29  ;;  %s386_s29 = sshra.s32 %s1374_s20, 7 }
  0x1b   : > { %s1365_s12 = sshll.u32 %s270_s11, 2 }
  0x1c   : > { %s272_s14 = scalar_lea.vmem %s2282_s0, %s1365_s12 }
  0x1d   : > { %v282_v2 = vld [vmem:[%s272_s14] sm:$0xf]  ;;  %s1375_s14 = sshll.u32 %s386_s29, 3 }
  0x1e   : > { %1602 = vmatprep.subr.msk.bf16.mxu0 %vm316_vm1, %v282_v2  ;;  %1603 = vmatprep.subr.msk.bf16.mxu1 %vm316_vm1, %v282_v2  ;;  %v318_v3 = vsel %vm316_vm1, %v282_v2, 0  ;;  %s389_s30 = scalar_lea.vmem [#allocation2], %s1375_s14 }
  0x1f   : > { %1503 = vmatpush3.bf16.msra.mxu0 %v318_v3  ;;  %1601 = vmatpush3.bf16.msra.mxu1 %v318_v3 }
  0x22   : > { %1505 = vmatmul.mubr.msk.bf16.vlgmr.msra.gmra.mrb[0].mxu0 %vm303_vm0, %v1680_v4  ;;  %1509 = vmatmul.mubr.msk.bf16.vlgmr.msra.gmra.mrb[0].mxu1 %vm303_vm0, %v1681_v5 }
  0xf5   : > { %v1506_v6 = vpop.f32.mrb[0].mxu0  ;;  %v1510_v7 = vpop.f32.mrb[0].mxu1 }
  0xf6   : > { %392 = vst [vmem:[%s389_s30 + $0x40] sm:$0xff] %v1506_v6  ;;  %396 = vst [vmem:[%s389_s30 + $0xc0] sm:$0xff] %v1510_v7  ;;  %410 = vadd.xlane.f32.xlu0 %v1510_v7  ;;  %v370_v8 = vpop.f32.mrb[1].mxu1  ;;  %402 = vadd.xlane.f32.xlu1 %v1506_v6  ;;  %v354_v9 = vpop.f32.mrb[1].mxu0  ;;  %v416_v14 = vmul.f32 %v1506_v6, %v1506_v6  ;;  %v420_v20 = vmul.f32 %v1510_v7, %v1510_v7 }
  0xf7   : > { %394 = vst [vmem:[%s389_s30 + $0x80] sm:$0xff] %v370_v8  ;;  %390 = vst [vmem:[%s389_s30] sm:$0xff] %v354_v9  ;;  %v1507_v10 = vpop.f32.mrb[2].mxu0  ;;  %v1511_v11 = vpop.f32.mrb[2].mxu1  ;;  %v414_v16 = vmul.f32 %v354_v9, %v354_v9  ;;  %v418_v18 = vmul.f32 %v370_v8, %v370_v8 }
  0xf8   : > { %393 = vst [vmem:[%s389_s30 + $0x60] sm:$0xff] %v1507_v10  ;;  %397 = vst [vmem:[%s389_s30 + $0xe0] sm:$0xff] %v1511_v11  ;;  %v357_v12 = vpop.f32.mrb[3].mxu0  ;;  %v373_v13 = vpop.f32.mrb[3].mxu1  ;;  %v417_v15 = vmul.f32 %v1507_v10, %v1507_v10  ;;  %v421_v21 = vmul.f32 %v1511_v11, %v1511_v11 }
  0xf9   : > { %391 = vst [vmem:[%s389_s30 + $0x20] sm:$0xff] %v357_v12  ;;  %395 = vst [vmem:[%s389_s30 + $0xa0] sm:$0xff] %v373_v13  ;;  %v415_v17 = vmul.f32 %v357_v12, %v357_v12  ;;  %v419_v19 = vmul.f32 %v373_v13, %v373_v13 }
  0xfa   : > { %398 = vadd.xlane.f32.xlu0 %v354_v9  ;;  %404 = vadd.xlane.f32.xlu1 %v1507_v10 }
  0xfe   : > { %406 = vadd.xlane.f32.xlu0 %v370_v8  ;;  %412 = vadd.xlane.f32.xlu1 %v1511_v11 }
 0x102   : > { %426 = vadd.xlane.f32.xlu0 %v416_v14  ;;  %408 = vadd.xlane.f32.xlu1 %v373_v13 }
 0x106   : > { %428 = vadd.xlane.f32.xlu1 %v417_v15  ;;  %400 = vadd.xlane.f32.xlu0 %v357_v12 }
 0x10a   : > { %422 = vadd.xlane.f32.xlu0 %v414_v16  ;;  %424 = vadd.xlane.f32.xlu1 %v415_v17 }
 0x10e   : > { %430 = vadd.xlane.f32.xlu0 %v418_v18  ;;  %432 = vadd.xlane.f32.xlu1 %v419_v19 }
 0x112   : > { %434 = vadd.xlane.f32.xlu0 %v420_v20  ;;  %436 = vadd.xlane.f32.xlu1 %v421_v21 }
 0x183   : > { %v411_v22 = vpop.xlane.xlu0 %410  ;;  %v403_v23 = vpop.xlane.xlu1 %402 }
 0x184   : > { %445 = vst.msk [vmem:[#allocation3 + $0x10] sm:$0xff] (!%p1376_p0), %vm442_vm2, %v403_v23  ;;  %449 = vst.msk [vmem:[#allocation3 + $0x30] sm:$0xff] (!%p1376_p0), %vm442_vm2, %v411_v22 }
 0x187   : > { %v399_v24 = vpop.xlane.xlu0 %398  ;;  %v405_v25 = vpop.xlane.xlu1 %404 }
 0x188   : > { %443 = vst.msk [vmem:[#allocation3] sm:$0xff] (!%p1376_p0), %vm442_vm2, %v399_v24  ;;  %446 = vst.msk [vmem:[#allocation3 + $0x18] sm:$0xff] (!%p1376_p0), %vm442_vm2, %v405_v25 }
 0x18b   : > { %v407_v26 = vpop.xlane.xlu0 %406  ;;  %v413_v27 = vpop.xlane.xlu1 %412 }
 0x18c   : > { %447 = vst.msk [vmem:[#allocation3 + $0x20] sm:$0xff] (!%p1376_p0), %vm442_vm2, %v407_v26  ;;  %450 = vst.msk [vmem:[#allocation3 + $0x38] sm:$0xff] (!%p1376_p0), %vm442_vm2, %v413_v27 }
 0x18f   : > { %v427_v28 = vpop.xlane.xlu0 %426  ;;  %v409_v29 = vpop.xlane.xlu1 %408 }
 0x190   : > { %448 = vst.msk [vmem:[#allocation3 + $0x28] sm:$0xff] (!%p1376_p0), %vm442_vm2, %v409_v29  ;;  %453 = vst.msk [vmem:[#allocation4 + $0x10] sm:$0xff] (!%p1376_p0), %vm442_vm2, %v427_v28 }
 0x193   : > { %v429_v30 = vpop.xlane.xlu1 %428  ;;  %v401_v31 = vpop.xlane.xlu0 %400 }
 0x194   : > { %444 = vst.msk [vmem:[#allocation3 + $0x8] sm:$0xff] (!%p1376_p0), %vm442_vm2, %v401_v31  ;;  %454 = vst.msk [vmem:[#allocation4 + $0x18] sm:$0xff] (!%p1376_p0), %vm442_vm2, %v429_v30 }
 0x197   : > { %v423_v32 = vpop.xlane.xlu0 %422  ;;  %v425_v33 = vpop.xlane.xlu1 %424 }
 0x198   : > { %451 = vst.msk [vmem:[#allocation4] sm:$0xff] (!%p1376_p0), %vm442_vm2, %v423_v32  ;;  %452 = vst.msk [vmem:[#allocation4 + $0x8] sm:$0xff] (!%p1376_p0), %vm442_vm2, %v425_v33 }
 0x199   : > { %441 = sbr.rel (%p1376_p0) target bundleno = 417 (0x1a1), region = 48 }
 0x19b   : > { %v1933_v34 = vpop.xlane.xlu0 %430  ;;  %v1935_v35 = vpop.xlane.xlu1 %432 }
 0x19c   : > { %455 = vst.msk [vmem:[#allocation4 + $0x20] sm:$0xff] (!%p1376_p0), %vm442_vm2, %v1933_v34  ;;  %456 = vst.msk [vmem:[#allocation4 + $0x28] sm:$0xff] (!%p1376_p0), %vm442_vm2, %v1935_v35 }
 0x19f   : > { %v1937_v36 = vpop.xlane.xlu0 %434  ;;  %v1939_v37 = vpop.xlane.xlu1 %436 }
 0x1a0   : > { %457 = vst.msk [vmem:[#allocation4 + $0x30] sm:$0xff] %vm442_vm2, %v1937_v36  ;;  %458 = vst.msk [vmem:[#allocation4 + $0x38] sm:$0xff] %vm442_vm2, %v1939_v37 }
 0x1a1 PF: > { %p1377_p1 = scmp.le.s32.totalorder %s1778_s24, 0 }
 0x1a2   : > { %v463_v38 = vld [vmem:[#allocation3] sm:$0xff] (!%p1377_p1)  ;;  %vm479_vm3 = vcmask (!%p1377_p1), 7168   ;;  %v464_v39 = vld [vmem:[#allocation3 + $0x8] sm:$0xff] (!%p1377_p1)  ;;  %v465_v40 = vld [vmem:[#allocation3 + $0x10] sm:$0xff] (!%p1377_p1) }
 0x1a3   : > { %462 = sbr.rel (%p1377_p1) target bundleno = 429 (0x1ad), region = 52  ;;  %v471_v41 = vadd.f32 (!%p1377_p1), %v463_v38, %v399_v24  ;;  %v472_v42 = vadd.f32 (!%p1377_p1), %v464_v39, %v401_v31  ;;  %v473_v43 = vadd.f32 (!%p1377_p1), %v465_v40, %v403_v23  ;;  %v466_v44 = vld [vmem:[#allocation3 + $0x18] sm:$0xff] (!%p1377_p1)  ;;  %v467_v45 = vld [vmem:[#allocation3 + $0x20] sm:$0xff] (!%p1377_p1)  ;;  %v468_v46 = vld [vmem:[#allocation3 + $0x28] sm:$0xff] (!%p1377_p1) }
 0x1a4   : > { %v474_v47 = vadd.f32 (!%p1377_p1), %v466_v44, %v405_v25  ;;  %v475_v48 = vadd.f32 (!%p1377_p1), %v467_v45, %v407_v26  ;;  %v476_v49 = vadd.f32 (!%p1377_p1), %v468_v46, %v409_v29  ;;  %v469_v50 = vld [vmem:[#allocation3 + $0x30] sm:$0xff] (!%p1377_p1)  ;;  %v470_v51 = vld [vmem:[#allocation3 + $0x38] sm:$0xff] (!%p1377_p1)  ;;  %v488_v52 = vld [vmem:[#allocation4] sm:$0xff] (!%p1377_p1) }
 0x1a5   : > { %480 = vst.msk [vmem:[#allocation3] sm:$0xff] (!%p1377_p1), %vm479_vm3, %v471_v41  ;;  %481 = vst.msk [vmem:[#allocation3 + $0x8] sm:$0xff] (!%p1377_p1), %vm479_vm3, %v472_v42  ;;  %v477_v53 = vadd.f32 (!%p1377_p1), %v469_v50, %v411_v22  ;;  %v478_v54 = vadd.f32 (!%p1377_p1), %v470_v51, %v413_v27  ;;  %v496_v55 = vadd.f32 (!%p1377_p1), %v488_v52, %v423_v32  ;;  %v489_v56 = vld [vmem:[#allocation4 + $0x8] sm:$0xff] (!%p1377_p1)  ;;  %v490_v57 = vld [vmem:[#allocation4 + $0x10] sm:$0xff] (!%p1377_p1) }
 0x1a6   : > { %482 = vst.msk [vmem:[#allocation3 + $0x10] sm:$0xff] (!%p1377_p1), %vm479_vm3, %v473_v43  ;;  %v491_v58 = vld [vmem:[#allocation4 + $0x18] sm:$0xff] (!%p1377_p1)  ;;  %483 = vst.msk [vmem:[#allocation3 + $0x18] sm:$0xff] (!%p1377_p1), %vm479_vm3, %v474_v47  ;;  %v497_v59 = vadd.f32 (!%p1377_p1), %v489_v56, %v425_v33  ;;  %v498_v60 = vadd.f32 (!%p1377_p1), %v490_v57, %v427_v28  ;;  %v492_v62 = vld [vmem:[#allocation4 + $0x20] sm:$0xff] (!%p1377_p1) }
 0x1a7   : > { %484 = vst.msk [vmem:[#allocation3 + $0x20] sm:$0xff] (!%p1377_p1), %vm479_vm3, %v475_v48  ;;  %485 = vst.msk [vmem:[#allocation3 + $0x28] sm:$0xff] (!%p1377_p1), %vm479_vm3, %v476_v49  ;;  %v499_v61 = vadd.f32 (!%p1377_p1), %v491_v58, %v429_v30  ;;  %v493_v63 = vld [vmem:[#allocation4 + $0x28] sm:$0xff] (!%p1377_p1)  ;;  %v494_v0 = vld [vmem:[#allocation4 + $0x30] sm:$0xff] (!%p1377_p1)  ;;  %v500_v1 = vadd.f32 (!%p1377_p1), %v492_v62, %v1933_v34 }
 0x1a8   : > { %486 = vst.msk [vmem:[#allocation3 + $0x30] sm:$0xff] (!%p1377_p1), %vm479_vm3, %v477_v53  ;;  %487 = vst.msk [vmem:[#allocation3 + $0x38] sm:$0xff] (!%p1377_p1), %vm479_vm3, %v478_v54  ;;  %v501_v2 = vadd.f32 (!%p1377_p1), %v493_v63, %v1935_v35  ;;  %v502_v3 = vadd.f32 (!%p1377_p1), %v494_v0, %v1937_v36  ;;  %v495_v4 = vld [vmem:[#allocation4 + $0x38] sm:$0xff] (!%p1377_p1) }
 0x1a9   : > { %504 = vst.msk [vmem:[#allocation4] sm:$0xff] (!%p1377_p1), %vm479_vm3, %v496_v55  ;;  %505 = vst.msk [vmem:[#allocation4 + $0x8] sm:$0xff] (!%p1377_p1), %vm479_vm3, %v497_v59  ;;  %v503_v5 = vadd.f32 (!%p1377_p1), %v495_v4, %v1939_v37 }
 0x1aa   : > { %506 = vst.msk [vmem:[#allocation4 + $0x10] sm:$0xff] %vm479_vm3, %v498_v60  ;;  %507 = vst.msk [vmem:[#allocation4 + $0x18] sm:$0xff] %vm479_vm3, %v499_v61 }
 0x1ab   : > { %508 = vst.msk [vmem:[#allocation4 + $0x20] sm:$0xff] %vm479_vm3, %v500_v1  ;;  %509 = vst.msk [vmem:[#allocation4 + $0x28] sm:$0xff] %vm479_vm3, %v501_v2 }
 0x1ac   : > { %510 = vst.msk [vmem:[#allocation4 + $0x30] sm:$0xff] %vm479_vm3, %v502_v3  ;;  %511 = vst.msk [vmem:[#allocation4 + $0x38] sm:$0xff] %vm479_vm3, %v503_v5 }
 0x1ad PF: > { %p1378_p2 = scmp.ne.s32.totalorder %s1778_s24, 3 }
 0x1ae   : > { %v1990_v6 = vld [vmem:[%s2285_s3] sm:$0xff] (!%p1378_p2)  ;;  %v1995_v7 = vld [vmem:[%s2285_s3 + $0x8] sm:$0xff] (!%p1378_p2)  ;;  %v2004_v16 = vld [vmem:[%s2285_s3 + $0x10] sm:$0xff] (!%p1378_p2)  ;;  %vm604_vm4 = vcmask (!%p1378_p2), 523264  }
 0x1af   : > { %515 = sbr.rel (%p1378_p2) target bundleno = 856 (0x358), region = 56  ;;  %v524_v8 = vld [vmem:[#allocation3] sm:$0xff] (!%p1378_p2)  ;;  %v525_v9 = vld [vmem:[#allocation3 + $0x8] sm:$0xff] (!%p1378_p2)  ;;  %v540_v10 = vmul.f32 (!%p1378_p2), 400.0, %v1990_v6  ;;  %v541_v11 = vmul.f32 (!%p1378_p2), 400.0, %v1995_v7  ;;  %v556_v12 = vmul.f32 (!%p1378_p2), 2.0, %v1990_v6 }
 0x1b0   : > { %v557_v13 = vmul.f32 (!%p1378_p2), 2.0, %v1995_v7  ;;  %v2009_v17 = vld [vmem:[%s2285_s3 + $0x18] sm:$0xff] (!%p1378_p2)  ;;  %v526_v22 = vld [vmem:[#allocation3 + $0x10] sm:$0xff] (!%p1378_p2)  ;;  %v542_v26 = vmul.f32 (!%p1378_p2), 400.0, %v2004_v16  ;;  %v558_v31 = vmul.f32 (!%p1378_p2), 2.0, %v2004_v16  ;;  %v2019_v32 = vld [vmem:[%s2285_s3 + $0x20] sm:$0xff] (!%p1378_p2) }
 0x1b1   : > { %v548_v18 = vadd.f32 (!%p1378_p2), %v540_v10, %v524_v8  ;;  %v549_v19 = vadd.f32 (!%p1378_p2), %v541_v11, %v525_v9  ;;  %v564_v20 = vmul.f32 (!%p1378_p2), %v556_v12, %v524_v8  ;;  %v527_v23 = vld [vmem:[#allocation3 + $0x18] sm:$0xff] (!%p1378_p2)  ;;  %v580_v24 = vmul.f32 (!%p1378_p2), %v540_v10, %v1990_v6  ;;  %v2024_v33 = vld [vmem:[%s2285_s3 + $0x28] sm:$0xff] (!%p1378_p2)  ;;  %v528_v44 = vld [vmem:[#allocation3 + $0x20] sm:$0xff] (!%p1378_p2) }
 0x1b2   : > { %v565_v21 = vmul.f32 (!%p1378_p2), %v557_v13, %v525_v9  ;;  %v581_v25 = vmul.f32 (!%p1378_p2), %v541_v11, %v1995_v7  ;;  %v543_v27 = vmul.f32 (!%p1378_p2), 400.0, %v2009_v17  ;;  %v550_v34 = vadd.f32 (!%p1378_p2), %v542_v26, %v526_v22  ;;  %v529_v45 = vld [vmem:[#allocation3 + $0x28] sm:$0xff] (!%p1378_p2)  ;;  %v596_v46 = vld [vmem:[%s2284_s2] sm:$0xff] (!%p1378_p2)  ;;  %v2040_v55 = vld [vmem:[%s2285_s3 + $0x30] sm:$0xff] (!%p1378_p2) }
 0x1b3   : > { %v532_v14 = vld [vmem:[#allocation4] sm:$0xff] (!%p1378_p2)  ;;  %v533_v15 = vld [vmem:[#allocation4 + $0x8] sm:$0xff] (!%p1378_p2)  ;;  %v1568_v28 = vpack.c.bf16 (!%p1378_p2), %v549_v19, %v548_v18  ;;  %v559_v36 = vmul.f32 (!%p1378_p2), 2.0, %v2009_v17  ;;  %v582_v39 = vmul.f32 (!%p1378_p2), %v542_v26, %v2004_v16  ;;  %v566_v42 = vmul.f32 (!%p1378_p2), %v558_v31, %v526_v22  ;;  %1528 = vmatprep.mubr.msk.f32.mxu0 (!%p1378_p2), %vm604_vm4, %v596_v46  ;;  %v2045_v56 = vld [vmem:[%s2285_s3 + $0x38] sm:$0xff] (!%p1378_p2)  ;;  %1556 = vmatprep.mubr.msk.f32.mxu1 (!%p1378_p2), %vm604_vm4, %v596_v46 }
 0x1b4   : > { %v572_v29 = vadd.f32 (!%p1378_p2), %v564_v20, %v532_v14  ;;  %v573_v30 = vadd.f32 (!%p1378_p2), %v565_v21, %v533_v15  ;;  %v551_v35 = vadd.f32 (!%p1378_p2), %v543_v27, %v527_v23  ;;  %v534_v37 = vld [vmem:[#allocation4 + $0x10] sm:$0xff] (!%p1378_p2)  ;;  %v535_v38 = vld [vmem:[#allocation4 + $0x18] sm:$0xff] (!%p1378_p2)  ;;  %v583_v43 = vmul.f32 (!%p1378_p2), %v543_v27, %v2009_v17  ;;  %v536_v60 = vld [vmem:[#allocation4 + $0x20] sm:$0xff] (!%p1378_p2) }
 0x1b5   : > { %1569 = vmatprep.subr.bf16.mxu0 (!%p1378_p2), %v1568_v28  ;;  %v567_v47 = vmul.f32 (!%p1378_p2), %v559_v36, %v527_v23  ;;  %v544_v49 = vmul.f32 (!%p1378_p2), 400.0, %v2019_v32  ;;  %v545_v50 = vmul.f32 (!%p1378_p2), 400.0, %v2024_v33  ;;  %v574_v52 = vadd.f32 (!%p1378_p2), %v566_v42, %v534_v37  ;;  %v537_v61 = vld [vmem:[#allocation4 + $0x28] sm:$0xff] (!%p1378_p2)  ;;  %v530_v3 = vld [vmem:[#allocation3 + $0x30] sm:$0xff] (!%p1378_p2)  ;;  %v531_v4 = vld [vmem:[#allocation3 + $0x38] sm:$0xff] (!%p1378_p2) }
 0x1b6   : > { %v588_v40 = vadd.f32 %v580_v24, %v572_v29  ;;  %v589_v41 = vadd.f32 %v581_v25, %v573_v30  ;;  %1571 = vmatpush3.bf16.msra.mxu0 %v1568_v28  ;;  %v1572_v48 = vpack.c.bf16 %v551_v35, %v550_v34  ;;  %v560_v53 = vmul.f32 2.0, %v2019_v32  ;;  %v538_v20 = vld [vmem:[#allocation4 + $0x30] sm:$0xff]  ;;  %v539_v21 = vld [vmem:[#allocation4 + $0x38] sm:$0xff]  ;;  %v597_v36 = vld [vmem:[%s2284_s2 + $0x8] sm:$0xff] }
 0x1b7   : > { %v561_v54 = vmul.f32 2.0, %v2024_v33  ;;  %v575_v57 = vadd.f32 %v567_v47, %v535_v38  ;;  %v552_v58 = vadd.f32 %v544_v49, %v528_v44  ;;  %v553_v59 = vadd.f32 %v545_v50, %v529_v45  ;;  %v598_v38 = vld [vmem:[%s2284_s2 + $0x10] sm:$0xff] }
 0x1b8   : > { %v1584_v51 = vpack.c.bf16 %v589_v41, %v588_v40  ;;  %1573 = vmatprep.subr.bf16.mxu0 %v1572_v48  ;;  %v584_v62 = vmul.f32 %v544_v49, %v2019_v32  ;;  %v590_v63 = vadd.f32 %v582_v39, %v574_v52  ;;  %v568_v0 = vmul.f32 %v560_v53, %v528_v44  ;;  %v599_v39 = vld [vmem:[%s2284_s2 + $0x18] sm:$0xff]  ;;  %v600_v40 = vld [vmem:[%s2284_s2 + $0x20] sm:$0xff]  ;;  %v601_v41 = vld [vmem:[%s2284_s2 + $0x28] sm:$0xff] }
 0x1b9   : > { %v569_v1 = vmul.f32 %v561_v54, %v529_v45  ;;  %v585_v2 = vmul.f32 %v545_v50, %v2024_v33  ;;  %v591_v5 = vadd.f32 %v583_v43, %v575_v57  ;;  %v1576_v8 = vpack.c.bf16 %v553_v59, %v552_v58  ;;  %v602_v42 = vld [vmem:[%s2284_s2 + $0x30] sm:$0xff]  ;;  %v603_v43 = vld [vmem:[%s2284_s2 + $0x38] sm:$0xff] }
 0x1ba   : > { %1585 = vmatprep.subr.bf16.mxu1 %v1584_v51  ;;  %1575 = vmatpush3.bf16.msra.mxu0 %v1572_v48  ;;  %v546_v9 = vmul.f32 400.0, %v2040_v55  ;;  %v547_v10 = vmul.f32 400.0, %v2045_v56  ;;  %v576_v11 = vadd.f32 %v568_v0, %v536_v60  ;;  %v562_v13 = vmul.f32 2.0, %v2040_v55 }
 0x1bb   : > { %1587 = vmatpush3.bf16.msra.mxu1 %v1584_v51  ;;  %v577_v12 = vadd.f32 %v569_v1, %v537_v61  ;;  %v563_v14 = vmul.f32 2.0, %v2045_v56  ;;  %v1588_v15 = vpack.c.bf16 %v591_v5, %v590_v63  ;;  %1577 = vmatprep.subr.bf16.mxu0 %v1576_v8  ;;  %v1796_v44 = vmov 0  }
 0x1bc   : > { %v554_v18 = vadd.f32 %v546_v9, %v530_v3  ;;  %v555_v19 = vadd.f32 %v547_v10, %v531_v4  ;;  %v586_v22 = vmul.f32 %v546_v9, %v2040_v55  ;;  %v592_v23 = vadd.f32 %v584_v62, %v576_v11  ;;  %1682 = vset.pattern.permute.xlu0 %v1796_v44 }
 0x1bd   : > { %v593_v24 = vadd.f32 %v585_v2, %v577_v12  ;;  %v570_v25 = vmul.f32 %v562_v13, %v530_v3  ;;  %v571_v26 = vmul.f32 %v563_v14, %v531_v4  ;;  %1589 = vmatprep.subr.bf16.mxu1 %v1588_v15  ;;  %v587_v28 = vmul.f32 %v547_v10, %v2045_v56 }
 0x1be   : > { %1579 = vmatpush3.bf16.msra.mxu0 %v1576_v8  ;;  %v1580_v27 = vpack.c.bf16 %v555_v19, %v554_v18  ;;  %1683 = vset.pattern.permute.xlu1 %v1796_v44 }
 0x1bf   : > { %1591 = vmatpush3.bf16.msra.mxu1 %v1588_v15  ;;  %v1592_v29 = vpack.c.bf16 %v593_v24, %v592_v23  ;;  %v578_v30 = vadd.f32 %v570_v25, %v538_v20  ;;  %v579_v31 = vadd.f32 %v571_v26, %v539_v21 }
 0x1c0   : > { %1581 = vmatprep.subr.bf16.mxu0 %v1580_v27 }
 0x1c1   : > { %1593 = vmatprep.subr.bf16.mxu1 %v1592_v29  ;;  %v594_v34 = vadd.f32 %v586_v22, %v578_v30  ;;  %v595_v35 = vadd.f32 %v587_v28, %v579_v31 }
 0x1c2   : > { %1583 = vmatpush3.bf16.msra.mxu0 %v1580_v27 }
 0x1c3   : > { %1595 = vmatpush3.bf16.msra.mxu1 %v1592_v29  ;;  %v1596_v37 = vpack.c.bf16 %v595_v35, %v594_v34  ;;  %v880_v34 = vld [vmem:[%s2286_s4 + $0x8] sm:$0xff] }
 0x1c5   : > { %1597 = vmatprep.subr.bf16.mxu1 %v1596_v37  ;;  %1529 = vmatmul.mubr.msk.f32.vlgmr.msra.gmra.mrb[0].mxu0 %vm604_vm4, %v597_v36 }
 0x1c6   : > { %1531 = vmatprep.mubr.msk.f32.mxu0 %vm604_vm4, %v598_v38 }
 0x1c7   : > { %1599 = vmatpush3.bf16.msra.mxu1 %v1596_v37 }
 0x1c9   : > { %1532 = vmatmul.mubr.msk.f32.gmra.mrb[2].mxu0 %vm604_vm4, %v599_v39 }
 0x1ca   : > { %1557 = vmatmul.mubr.msk.f32.vlgmr.msra.gmra.mrb[0].mxu1 %vm604_vm4, %v597_v36  ;;  %1534 = vmatprep.mubr.msk.f32.mxu0 %vm604_vm4, %v600_v40  ;;  %v879_v36 = vld [vmem:[%s2286_s4] sm:$0xff] }
 0x1cb   : > { %1559 = vmatprep.mubr.msk.f32.mxu1 %vm604_vm4, %v598_v38 }
 0x1cd   : > { %1535 = vmatmul.mubr.msk.f32.gmra.mrb[4].mxu0 %vm604_vm4, %v601_v41 }
 0x1ce   : > { %1560 = vmatmul.mubr.msk.f32.gmra.mrb[2].mxu1 %vm604_vm4, %v599_v39  ;;  %1537 = vmatprep.mubr.msk.f32.mxu0 %vm604_vm4, %v602_v42 }
 0x1cf   : > { %1562 = vmatprep.mubr.msk.f32.mxu1 %vm604_vm4, %v600_v40 }
 0x1d1   : > { %1538 = vmatmul.mubr.msk.f32.gmra.mrb[6].mxu0 %vm604_vm4, %v603_v43 }
 0x1d2   : > { %1563 = vmatmul.mubr.msk.f32.gmra.mrb[4].mxu1 %vm604_vm4, %v601_v41 }
 0x1d3   : > { %1565 = vmatprep.mubr.msk.f32.mxu1 %vm604_vm4, %v602_v42 }
 0x1d6   : > { %1566 = vmatmul.mubr.msk.f32.gmra.mrb[6].mxu1 %vm604_vm4, %v603_v43 }
 0x298   : > { %v2091_v45 = vpop.f32.mrb[0].mxu0 }
 0x299   : > { %v2093_v46 = vpop.f32.mrb[1].mxu0  ;;  %v840_v47 = vmul.f32 %v2091_v45, %v2091_v45  ;;  %v904_v40 = vsub.f32 %v1995_v7, %v2091_v45 }
 0x29a   : > { %v839_v48 = vmul.f32 %v2093_v46, %v2093_v46  ;;  %v903_v43 = vsub.f32 %v1990_v6, %v2093_v46 }
 0x29c   : > { %v2099_v49 = vpop.f32.mrb[2].mxu0 }
 0x29d   : > { %v1558_v50 = vpop.f32.mrb[0].mxu1  ;;  %v2101_v51 = vpop.f32.mrb[3].mxu0  ;;  %v842_v53 = vmul.f32 %v2099_v49, %v2099_v49 }
 0x29e   : > { %v848_v52 = vsub.f32 %v1558_v50, %v840_v47  ;;  %v800_v54 = vpop.f32.mrb[1].mxu1  ;;  %v841_v58 = vmul.f32 %v2101_v51, %v2101_v51  ;;  %v882_v47 = vld [vmem:[%s2286_s4 + $0x18] sm:$0xff]  ;;  %v881_v50 = vld [vmem:[%s2286_s4 + $0x10] sm:$0xff]  ;;  %v905_v46 = vsub.f32 %v2004_v16, %v2101_v51  ;;  %v883_v16 = vld [vmem:[%s2286_s4 + $0x20] sm:$0xff] }
 0x29f   : > { %v847_v57 = vsub.f32 %v800_v54, %v839_v48  ;;  %v895_v54 = vld [vmem:[%s2287_s5] sm:$0xff] }
 0x2a0   : > { %v856_v59 = vmax.f32 %v848_v52, 0.0  ;;  %v2107_v60 = vpop.f32.mrb[4].mxu0 }
 0x2a1   : > { %v855_v61 = vmax.f32 %v847_v57, 0.0  ;;  %v1561_v62 = vpop.f32.mrb[2].mxu1  ;;  %v2109_v63 = vpop.f32.mrb[5].mxu0  ;;  %v844_v3 = vmul.f32 %v2107_v60, %v2107_v60  ;;  %v896_v57 = vld [vmem:[%s2287_s5 + $0x8] sm:$0xff] }
 0x2a2   : > { %v864_v0 = vadd.f32 1e-05, %v856_v59  ;;  %v850_v1 = vsub.f32 %v1561_v62, %v842_v53  ;;  %v810_v2 = vpop.f32.mrb[3].mxu1  ;;  %v843_v8 = vmul.f32 %v2109_v63, %v2109_v63  ;;  %v906_v53 = vsub.f32 %v2009_v17, %v2099_v49  ;;  %v884_v59 = vld [vmem:[%s2286_s4 + $0x28] sm:$0xff] }
 0x2a3   : > { %v863_v4 = vadd.f32 1e-05, %v855_v61  ;;  %v849_v5 = vsub.f32 %v810_v2, %v841_v58  ;;  %v908_v62 = vsub.f32 %v2024_v33, %v2107_v60 }
 0x2a4   : > { %1684 = vrsqrt.f32 %v864_v0  ;;  %v858_v9 = vmax.f32 %v850_v1, 0.0  ;;  %v2115_v10 = vpop.f32.mrb[6].mxu0 }
 0x2a5   : > { %1686 = vrsqrt.f32 %v863_v4  ;;  %v857_v11 = vmax.f32 %v849_v5, 0.0  ;;  %v1564_v12 = vpop.f32.mrb[4].mxu1  ;;  %v2117_v13 = vpop.f32.mrb[7].mxu0  ;;  %v846_v19 = vmul.f32 %v2115_v10, %v2115_v10  ;;  %v886_v5 = vld [vmem:[%s2286_s4 + $0x38] sm:$0xff] }
 0x2a6   : > { %v866_v14 = vadd.f32 1e-05, %v858_v9  ;;  %v852_v15 = vsub.f32 %v1564_v12, %v844_v3  ;;  %v820_v18 = vpop.f32.mrb[5].mxu1  ;;  %v845_v22 = vmul.f32 %v2117_v13, %v2117_v13  ;;  %v907_v3 = vsub.f32 %v2019_v32, %v2109_v63  ;;  %v897_v63 = vld [vmem:[%s2287_s5 + $0x10] sm:$0xff] }
 0x2a7   : > { %v865_v20 = vadd.f32 1e-05, %v857_v11  ;;  %v851_v21 = vsub.f32 %v820_v18, %v843_v8  ;;  %v885_v8 = vld [vmem:[%s2286_s4 + $0x30] sm:$0xff]  ;;  %v910_v12 = vsub.f32 %v2045_v56, %v2115_v10  ;;  %v909_v32 = vsub.f32 %v2040_v55, %v2117_v13  ;;  %v899_v55 = vld [vmem:[%s2287_s5 + $0x20] sm:$0xff]  ;;  %v900_v13 = vld [vmem:[%s2287_s5 + $0x28] sm:$0xff] }
 0x2a8   : > { %1688 = vrsqrt.f32 %v866_v14  ;;  %v860_v23 = vmax.f32 %v852_v15, 0.0 }
 0x2a9   : > { %1690 = vrsqrt.f32 %v865_v20  ;;  %v859_v24 = vmax.f32 %v851_v21, 0.0  ;;  %v1567_v25 = vpop.f32.mrb[6].mxu1  ;;  %v898_v21 = vld [vmem:[%s2287_s5 + $0x18] sm:$0xff] }
 0x2aa   : > { %v868_v26 = vadd.f32 1e-05, %v860_v23  ;;  %v854_v27 = vsub.f32 %v1567_v25, %v846_v19  ;;  %v830_v28 = vpop.f32.mrb[7].mxu1  ;;  %v902_v25 = vld [vmem:[%s2287_s5 + $0x38] sm:$0xff] }
 0x2ab   : > { %v867_v29 = vadd.f32 1e-05, %v859_v24  ;;  %v853_v30 = vsub.f32 %v830_v28, %v845_v22  ;;  %v901_v22 = vld [vmem:[%s2287_s5 + $0x30] sm:$0xff]  ;;  %v928_v28 = vld [vmem:[#allocation2 + $0x20] sm:$0xff] }
 0x2ac   : > { %1692 = vrsqrt.f32 %v868_v26  ;;  %v862_v31 = vmax.f32 %v854_v27, 0.0 }
 0x2ad   : > { %1694 = vrsqrt.f32 %v867_v29  ;;  %v861_v35 = vmax.f32 %v853_v30, 0.0  ;;  %v927_v29 = vld [vmem:[#allocation2] sm:$0xff]  ;;  %v1071_v30 = vld [vmem:[#allocation2 + $0x8] sm:$0xff] }
 0x2ae   : > { %v1685_v37 = vpop.eup %1684  ;;  %v870_v38 = vadd.f32 1e-05, %v862_v31  ;;  %v1135_v31 = vld [vmem:[#allocation2 + $0x10] sm:$0xff] }
 0x2af   : > { %v1687_v39 = vpop.eup %1686  ;;  %v869_v41 = vadd.f32 1e-05, %v861_v35  ;;  %v888_v42 = vmul.f32 %v1685_v37, %v880_v34  ;;  %v1199_v34 = vld [vmem:[#allocation2 + $0x18] sm:$0xff]  ;;  %v1072_v37 = vld [vmem:[#allocation2 + $0x28] sm:$0xff] }
 0x2b0   : > { %1696 = vrsqrt.f32 %v870_v38  ;;  %v887_v44 = vmul.f32 %v1687_v39, %v879_v36  ;;  %v1136_v38 = vld [vmem:[#allocation2 + $0x30] sm:$0xff]  ;;  %v1200_v39 = vld [vmem:[#allocation2 + $0x38] sm:$0xff] }
 0x2b1   : > { %1698 = vrsqrt.f32 %v869_v41  ;;  %942 = vperm.xlu0 %1682, %v888_v42   ;;  %v912_v48 = vmul.f32 %v904_v40, %v888_v42 }
 0x2b2   : > { %v1689_v52 = vpop.eup %1688  ;;  %v911_v7 = vmul.f32 %v903_v43, %v887_v44 }
 0x2b3   : > { %v1691_v45 = vpop.eup %1690  ;;  %v890_v6 = vmul.f32 %v1689_v52, %v882_v47  ;;  %v920_v1 = vadd.f32 %v912_v48, %v896_v57 }
 0x2b4   : > { %v889_v58 = vmul.f32 %v1691_v45, %v881_v50  ;;  %v919_v0 = vadd.f32 %v911_v7, %v895_v54 }
 0x2b5   : > { %937 = vperm.xlu0 %1682, %v887_v44   ;;  %952 = vperm.xlu1 %1683, %v890_v6   ;;  %v914_v17 = vmul.f32 %v906_v53, %v890_v6 }
 0x2b6   : > { %v1693_v49 = vpop.eup %1692  ;;  %v913_v51 = vmul.f32 %v905_v46, %v889_v58 }
 0x2b7   : > { %v1695_v61 = vpop.eup %1694  ;;  %v892_v2 = vmul.f32 %v1693_v49, %v884_v59  ;;  %v922_v56 = vadd.f32 %v914_v17, %v898_v21 }
 0x2b8   : > { %v891_v4 = vmul.f32 %v1695_v61, %v883_v16  ;;  %v921_v20 = vadd.f32 %v913_v51, %v897_v63 }
 0x2b9   : > { %985 = vperm.xlu0 %1682, %v919_v0   ;;  %990 = vperm.xlu1 %1683, %v920_v1   ;;  %v916_v9 = vmul.f32 %v908_v62, %v892_v2 }
 0x2ba   : > { %v1697_v11 = vpop.eup %1696  ;;  %v915_v33 = vmul.f32 %v907_v3, %v891_v4 }
 0x2bb   : > { %v1699_v60 = vpop.eup %1698  ;;  %v894_v14 = vmul.f32 %v1697_v11, %v886_v5  ;;  %v924_v23 = vadd.f32 %v916_v9, %v900_v13  ;;  %v1073_v5 = vld [vmem:[#allocation2 + $0x48] sm:$0xff]  ;;  %v1201_v9 = vld [vmem:[#allocation2 + $0x58] sm:$0xff]  ;;  %v930_v11 = vld [vmem:[#allocation2 + $0x60] sm:$0xff] }
 0x2bc   : > { %v893_v15 = vmul.f32 %v1699_v60, %v885_v8  ;;  %v923_v10 = vadd.f32 %v915_v33, %v899_v55  ;;  %v1137_v8 = vld [vmem:[#allocation2 + $0x50] sm:$0xff]  ;;  %v1074_v33 = vld [vmem:[#allocation2 + $0x68] sm:$0xff] }
 0x2bd   : > { %947 = vperm.xlu1 %1683, %v889_v58   ;;  %957 = vperm.xlu0 %1682, %v891_v4   ;;  %v918_v18 = vmul.f32 %v910_v12, %v894_v14  ;;  %v1138_v60 = vld [vmem:[#allocation2 + $0x70] sm:$0xff]  ;;  %v1202_v12 = vld [vmem:[#allocation2 + $0x78] sm:$0xff] }
 0x2be   : > { %v917_v19 = vmul.f32 %v909_v32, %v893_v15 }
 0x2bf   : > { %v926_v26 = vadd.f32 %v918_v18, %v902_v25  ;;  %v1075_v25 = vld [vmem:[#allocation2 + $0x88] sm:$0xff] }
 0x2c0   : > { %v925_v24 = vadd.f32 %v917_v19, %v901_v22 }
 0x2c1   : > { %962 = vperm.xlu1 %1683, %v892_v2   ;;  %995 = vperm.xlu0 %1682, %v921_v20   ;;  %v929_v2 = vld [vmem:[#allocation2 + $0x40] sm:$0xff] }
 0x2c2   : > { %v931_v20 = vld [vmem:[#allocation2 + $0x80] sm:$0xff] }
 0x2c5   : > { %1000 = vperm.xlu1 %1683, %v922_v56   ;;  %967 = vperm.xlu0 %1682, %v893_v15  }
 0x2c9   : > { %972 = vperm.xlu1 %1683, %v894_v14   ;;  %1005 = vperm.xlu0 %1682, %v923_v10  }
 0x2cd   : > { %1010 = vperm.xlu1 %1683, %v924_v23   ;;  %1015 = vperm.xlu0 %1682, %v925_v24  }
 0x2d1   : > { %1020 = vperm.xlu1 %1683, %v926_v26   ;;  %v1139_v26 = vld [vmem:[#allocation2 + $0x90] sm:$0xff] }
 0x330   : > { %v943_v27 = vpop.permute.xlu0 %942 }
 0x331   : > { %v976_v44 = vmul.f32 %v943_v27, %v928_v28  ;;  %v1080_v47 = vmul.f32 %v1072_v37, %v943_v27  ;;  %v1144_v48 = vmul.f32 %v1136_v38, %v943_v27  ;;  %v1208_v50 = vmul.f32 %v1200_v39, %v943_v27  ;;  %v1203_v27 = vld [vmem:[#allocation2 + $0x98] sm:$0xff]  ;;  %v932_v28 = vld [vmem:[#allocation2 + $0xa0] sm:$0xff]  ;;  %v1076_v38 = vld [vmem:[#allocation2 + $0xa8] sm:$0xff] }
 0x332   : > { %v1140_v39 = vld [vmem:[#allocation2 + $0xb0] sm:$0xff] }
 0x334   : > { %v938_v35 = vpop.permute.xlu0 %937  ;;  %v953_v36 = vpop.permute.xlu1 %952 }
 0x335   : > { %v975_v40 = vmul.f32 %v938_v35, %v927_v29  ;;  %v1079_v41 = vmul.f32 %v1071_v30, %v938_v35  ;;  %v1143_v42 = vmul.f32 %v1135_v31, %v938_v35  ;;  %v1207_v43 = vmul.f32 %v1199_v34, %v938_v35 }
 0x336   : > { %v978_v13 = vmul.f32 %v953_v36, %v930_v11  ;;  %v1082_v22 = vmul.f32 %v1074_v33, %v953_v36  ;;  %v1146_v23 = vmul.f32 %v1138_v60, %v953_v36  ;;  %v1210_v24 = vmul.f32 %v1202_v12, %v953_v36 }
 0x338   : > { %v986_v52 = vpop.permute.xlu0 %985  ;;  %v991_v7 = vpop.permute.xlu1 %990 }
 0x339   : > { %v1023_v45 = vadd.f32 %v986_v52, %v975_v40  ;;  %v1087_v53 = vadd.f32 %v1079_v41, %v986_v52  ;;  %v1151_v6 = vadd.f32 %v1143_v42, %v986_v52  ;;  %v1215_v46 = vadd.f32 %v1207_v43, %v986_v52  ;;  %v1204_v40 = vld [vmem:[#allocation2 + $0xb8] sm:$0xff]  ;;  %v933_v52 = vld [vmem:[#allocation2 + $0xc0] sm:$0xff] }
 0x33a   : > { %v1024_v54 = vadd.f32 %v991_v7, %v976_v44  ;;  %v1088_v57 = vadd.f32 %v1080_v47, %v991_v7  ;;  %v1152_v58 = vadd.f32 %v1144_v48, %v991_v7  ;;  %v1216_v59 = vadd.f32 %v1208_v50, %v991_v7 }
 0x33b   : > { %v1432_v17 = vpack.c.bf16 %v1023_v45, %v1023_v45  ;;  %v1440_v16 = vpack.c.bf16 %v1087_v53, %v1087_v53  ;;  %v1448_v49 = vpack.c.bf16 %v1151_v6, %v1151_v6  ;;  %v1456_v51 = vpack.c.bf16 %v1215_v46, %v1215_v46  ;;  %v1077_v46 = vld [vmem:[#allocation2 + $0xc8] sm:$0xff] }
 0x33c   : > { %v1433_v61 = vpack.c.bf16 %v1024_v54, %v1024_v54  ;;  %v1441_v62 = vpack.c.bf16 %v1088_v57, %v1088_v57  ;;  %v1449_v0 = vpack.c.bf16 %v1152_v58, %v1152_v58  ;;  %v1457_v1 = vpack.c.bf16 %v1216_v59, %v1216_v59  ;;  %v948_v3 = vpop.permute.xlu1 %947  ;;  %v958_v4 = vpop.permute.xlu0 %957  ;;  %v1141_v54 = vld [vmem:[#allocation2 + $0xd0] sm:$0xff]  ;;  %v1205_v57 = vld [vmem:[#allocation2 + $0xd8] sm:$0xff] }
 0x33d   : > { %1063 = vst [vmem:[%s1942_s7] sm:$0xf] %v1432_v17  ;;  %1127 = vst [vmem:[%s1942_s7 + $0x4] sm:$0xf] %v1440_v16  ;;  %v977_v14 = vmul.f32 %v948_v3, %v929_v2  ;;  %v1081_v32 = vmul.f32 %v1073_v5, %v948_v3  ;;  %v1145_v63 = vmul.f32 %v1137_v8, %v948_v3  ;;  %v1206_v5 = vld [vmem:[#allocation2 + $0xf8] sm:$0xff] }
 0x33e   : > { %1191 = vst [vmem:[%s1942_s7 + $0x8] sm:$0xf] %v1448_v49  ;;  %1255 = vst [vmem:[%s1942_s7 + $0xc] sm:$0xf] %v1456_v51  ;;  %v1209_v15 = vmul.f32 %v1201_v9, %v948_v3  ;;  %v979_v44 = vmul.f32 %v958_v4, %v931_v20  ;;  %v1083_v47 = vmul.f32 %v1075_v25, %v958_v4  ;;  %v1078_v3 = vld [vmem:[#allocation2 + $0xe8] sm:$0xff] }
 0x33f   : > { %1064 = vst [vmem:[%s1942_s7 + $0x10] sm:$0xf] %v1433_v61  ;;  %1128 = vst [vmem:[%s1942_s7 + $0x14] sm:$0xf] %v1441_v62  ;;  %v1147_v48 = vmul.f32 %v1139_v26, %v958_v4  ;;  %v1211_v50 = vmul.f32 %v1203_v27, %v958_v4  ;;  %v934_v61 = vld [vmem:[#allocation2 + $0xe0] sm:$0xff]  ;;  %v1142_v4 = vld [vmem:[#allocation2 + $0xf0] sm:$0xff] }
 0x340   : > { %1192 = vst [vmem:[%s1942_s7 + $0x18] sm:$0xf] %v1449_v0  ;;  %1256 = vst [vmem:[%s1942_s7 + $0x1c] sm:$0xf] %v1457_v1  ;;  %v963_v18 = vpop.permute.xlu1 %962  ;;  %v996_v19 = vpop.permute.xlu0 %995 }
 0x341   : > { %v1025_v21 = vadd.f32 %v996_v19, %v977_v14  ;;  %v1089_v56 = vadd.f32 %v1081_v32, %v996_v19  ;;  %v1153_v55 = vadd.f32 %v1145_v63, %v996_v19  ;;  %v1217_v10 = vadd.f32 %v1209_v15, %v996_v19 }
 0x342   : > { %v980_v58 = vmul.f32 %v963_v18, %v932_v28  ;;  %v1084_v59 = vmul.f32 %v1076_v38, %v963_v18  ;;  %v1148_v17 = vmul.f32 %v1140_v39, %v963_v18  ;;  %v1212_v16 = vmul.f32 %v1204_v40, %v963_v18 }
 0x343   : > { %v1434_v29 = vpack.c.bf16 %v1025_v21, %v1025_v21  ;;  %v1442_v30 = vpack.c.bf16 %v1089_v56, %v1089_v56  ;;  %v1450_v31 = vpack.c.bf16 %v1153_v55, %v1153_v55  ;;  %v1458_v34 = vpack.c.bf16 %v1217_v10, %v1217_v10 }
 0x344   : > { %v1001_v35 = vpop.permute.xlu1 %1000  ;;  %v968_v37 = vpop.permute.xlu0 %967 }
 0x345   : > { %v1026_v41 = vadd.f32 %v1001_v35, %v978_v13  ;;  %v1090_v42 = vadd.f32 %v1082_v22, %v1001_v35  ;;  %v1154_v36 = vadd.f32 %v1146_v23, %v1001_v35  ;;  %v1218_v43 = vadd.f32 %v1210_v24, %v1001_v35  ;;  %1065 = vst [vmem:[%s1942_s7 + $0x20] sm:$0xf] %v1434_v29 }
 0x346   : > { %1129 = vst [vmem:[%s1942_s7 + $0x24] sm:$0xf] %v1442_v30  ;;  %1193 = vst [vmem:[%s1942_s7 + $0x28] sm:$0xf] %v1450_v31  ;;  %v981_v8 = vmul.f32 %v968_v37, %v933_v52  ;;  %v1085_v9 = vmul.f32 %v1077_v46, %v968_v37  ;;  %v1149_v11 = vmul.f32 %v1141_v54, %v968_v37 }
 0x347   : > { %1257 = vst [vmem:[%s1942_s7 + $0x2c] sm:$0xf] %v1458_v34  ;;  %v1435_v7 = vpack.c.bf16 %v1026_v41, %v1026_v41  ;;  %v1443_v45 = vpack.c.bf16 %v1090_v42, %v1090_v42  ;;  %v1451_v53 = vpack.c.bf16 %v1154_v36, %v1154_v36  ;;  %v1459_v6 = vpack.c.bf16 %v1218_v43, %v1218_v43 }
 0x348   : > { %v973_v49 = vpop.permute.xlu1 %972  ;;  %v1006_v51 = vpop.permute.xlu0 %1005  ;;  %v1213_v33 = vmul.f32 %v1205_v57, %v968_v37 }
 0x349   : > { %1066 = vst [vmem:[%s1942_s7 + $0x30] sm:$0xf] %v1435_v7  ;;  %1130 = vst [vmem:[%s1942_s7 + $0x34] sm:$0xf] %v1443_v45  ;;  %v1027_v62 = vadd.f32 %v1006_v51, %v979_v44  ;;  %v1091_v0 = vadd.f32 %v1083_v47, %v1006_v51  ;;  %v1155_v1 = vadd.f32 %v1147_v48, %v1006_v51 }
 0x34a   : > { %1194 = vst [vmem:[%s1942_s7 + $0x38] sm:$0xf] %v1451_v53  ;;  %1258 = vst [vmem:[%s1942_s7 + $0x3c] sm:$0xf] %v1459_v6  ;;  %v1219_v2 = vadd.f32 %v1211_v50, %v1006_v51  ;;  %v982_v18 = vmul.f32 %v973_v49, %v934_v61  ;;  %v1086_v19 = vmul.f32 %v1078_v3, %v973_v49 }
 0x34b   : > { %v1436_v60 = vpack.c.bf16 %v1027_v62, %v1027_v62  ;;  %v1444_v12 = vpack.c.bf16 %v1091_v0, %v1091_v0  ;;  %v1452_v14 = vpack.c.bf16 %v1155_v1, %v1155_v1  ;;  %v1150_v20 = vmul.f32 %v1142_v4, %v973_v49 }
 0x34c   : > { %v1460_v32 = vpack.c.bf16 %v1219_v2, %v1219_v2  ;;  %v1011_v63 = vpop.permute.xlu1 %1010  ;;  %v1016_v15 = vpop.permute.xlu0 %1015  ;;  %v1214_v21 = vmul.f32 %v1206_v5, %v973_v49 }
 0x34d   : > { %1067 = vst [vmem:[%s1942_s7 + $0x40] sm:$0xf] %v1436_v60  ;;  %1131 = vst [vmem:[%s1942_s7 + $0x44] sm:$0xf] %v1444_v12  ;;  %v1028_v56 = vadd.f32 %v1011_v63, %v980_v58  ;;  %v1092_v55 = vadd.f32 %v1084_v59, %v1011_v63  ;;  %v1156_v10 = vadd.f32 %v1148_v17, %v1011_v63 }
 0x34e   : > { %1195 = vst [vmem:[%s1942_s7 + $0x48] sm:$0xf] %v1452_v14  ;;  %1259 = vst [vmem:[%s1942_s7 + $0x4c] sm:$0xf] %v1460_v32  ;;  %v1220_v13 = vadd.f32 %v1212_v16, %v1011_v63  ;;  %v1029_v22 = vadd.f32 %v1016_v15, %v981_v8  ;;  %v1093_v23 = vadd.f32 %v1085_v9, %v1016_v15 }
 0x34f   : > { %v1157_v24 = vadd.f32 %v1149_v11, %v1016_v15  ;;  %v1221_v25 = vadd.f32 %v1213_v33, %v1016_v15  ;;  %v1437_v26 = vpack.c.bf16 %v1028_v56, %v1028_v56  ;;  %v1445_v27 = vpack.c.bf16 %v1092_v55, %v1092_v55 }
 0x350   : > { %v1453_v28 = vpack.c.bf16 %v1156_v10, %v1156_v10  ;;  %v1461_v29 = vpack.c.bf16 %v1220_v13, %v1220_v13  ;;  %v1438_v30 = vpack.c.bf16 %v1029_v22, %v1029_v22  ;;  %v1446_v31 = vpack.c.bf16 %v1093_v23, %v1093_v23  ;;  %v1021_v37 = vpop.permute.xlu1 %1020 }
 0x351   : > { %v1454_v34 = vpack.c.bf16 %v1157_v24, %v1157_v24  ;;  %v1462_v35 = vpack.c.bf16 %v1221_v25, %v1221_v25  ;;  %1068 = vst [vmem:[%s1942_s7 + $0x50] sm:$0xf] %v1437_v26  ;;  %1132 = vst [vmem:[%s1942_s7 + $0x54] sm:$0xf] %v1445_v27  ;;  %v1030_v38 = vadd.f32 %v1021_v37, %v982_v18 }
 0x352   : > { %1196 = vst [vmem:[%s1942_s7 + $0x58] sm:$0xf] %v1453_v28  ;;  %1260 = vst [vmem:[%s1942_s7 + $0x5c] sm:$0xf] %v1461_v29  ;;  %v1094_v39 = vadd.f32 %v1086_v19, %v1021_v37  ;;  %v1158_v40 = vadd.f32 %v1150_v20, %v1021_v37  ;;  %v1222_v41 = vadd.f32 %v1214_v21, %v1021_v37 }
 0x353   : > { %1069 = vst [vmem:[%s1942_s7 + $0x60] sm:$0xf] %v1438_v30  ;;  %1133 = vst [vmem:[%s1942_s7 + $0x64] sm:$0xf] %v1446_v31  ;;  %v1439_v42 = vpack.c.bf16 %v1030_v38, %v1030_v38 }
 0x354   : > { %1197 = vst [vmem:[%s1942_s7 + $0x68] sm:$0xf] %v1454_v34  ;;  %1261 = vst [vmem:[%s1942_s7 + $0x6c] sm:$0xf] %v1462_v35  ;;  %v1447_v36 = vpack.c.bf16 %v1094_v39, %v1094_v39  ;;  %v1455_v43 = vpack.c.bf16 %v1158_v40, %v1158_v40  ;;  %v1463_v44 = vpack.c.bf16 %v1222_v41, %v1222_v41 }
 0x355   : > { %1070 = vst [vmem:[%s1942_s7 + $0x70] sm:$0xf] %v1439_v42 }
 0x356   : > { %1134 = vst [vmem:[%s1942_s7 + $0x74] sm:$0xf] %v1447_v36  ;;  %1198 = vst [vmem:[%s1942_s7 + $0x78] sm:$0xf] %v1455_v43 }
 0x357   : > { %1262 = vst [vmem:[%s1942_s7 + $0x7c] sm:$0xf] %v1463_v44 }
 0x358 PF: > { %s1464_s30 = sshll.u32 %s1782_s25, 11  ;;  %s1277_s12 = sshll.u32 %s1942_s7, 4  ;;  %s2226_s12 = int_to_ptr.vmem [resolvable:$true] %s1277_s12 }
 0x359   : > { %s2223_s11 = scalar_lea.hbm %s2288_s6, %s1464_s30  ;;  %s2295_s24 = sand.u32 1, %s1770_s22  }
 0x35a   : > { %s2230_s15 = scalar_lea.sflag [#allocation6], %s2295_s24  ;;  %s1700_s16 = scalar_lea.vmem %s2226_s12, 2048 }
 0x35b   : > { %p1701_p4 = scmp.ne.s32.totalorder %s2226_s12, %s1700_s16  ;;  %s1797_s25 = smov [#allocation5]  }
 0x35c   : > { %s1704_s18 = sshll.u32 %s1797_s25, 4  ;;  %s1705_s18 = int_to_ptr.vmem [resolvable:$false] %s1704_s18 }
 0x35d   : > { %p1702_p5 = pnand %p1701_p4, %p1884_p3  ;;  %s1706_s19 = scalar_lea.vmem %s1705_s18, 4096 }
 0x35e   : > { %p1707_p7 = scmp.lt.s32.totalorder %s2226_s12, %s1705_s18  ;;  %p1708_p8 = scmp.lt.s32.totalorder %s1706_s19, %s1700_s16 }
 0x35f   : > { %p1703_p6 = pneg %p1702_p5 }
 0x360   : > { %p1709_p10 = por %p1708_p8, %p1707_p7 }
 0x362   : > { %p1710_p11 = pnand %p1709_p10, %p1703_p6 }
 0x364   : > { %1713 = shalt.err (!%p1710_p11)
}
 0x365   : > { %s1714_s7 = scalar_lea.hbm %s2223_s11, 2048  ;;  %s1718_s14 = scalar_lea.hbm %s2288_s6, 4096 }
 0x366   : > { %p1715_p12 = scmp.ne.s32.totalorder %s2223_s11, %s1714_s7  ;;  %p1719_p1 = scmp.lt.u32.totalorder %s2223_s11, %s2288_s6 }
 0x367   : > { %p1720_p2 = scmp.lt.u32.totalorder %s1718_s14, %s1714_s7  ;;  %p1722_p5 = scmp.lt.u32.totalorder %s1714_s7, %s2223_s11 }
 0x368   : > { %p1716_p13 = pnand %p1715_p12, %p1884_p3 }
 0x369   : > { %p1721_p4 = por %p1720_p2, %p1719_p1 }
 0x36a   : > { %p1717_p0 = pneg %p1716_p13 }
 0x36b   : > { %p1723_p6 = por %p1722_p5, %p1721_p4 }
 0x36d   : > { %p1724_p7 = pnand %p1723_p6, %p1717_p0 }
 0x36f   : > { %1727 = shalt.err (!%p1724_p7)
}
 0x370   : > { %s1798_s17 = smov 256   ;;  %s1799_s24 = smov 16  }
 0x371   : > { %1604 = dma.vmem_to_hbm [thread:$0]  (%p1884_p3), %s2226_s12, 2048, %s2223_s11, %s2230_s15, %s1798_s17, %s1798_s17, %s1799_s24  }
 0x372 PF: > { %p1610_p8 = scmp.ge.s32.totalorder %s1794_s28, 2  ;;  %s1292_s16 = sand.u32 1, %s1766_s21  }
 0x373   : > { %s1293_s25 = scalar_lea.sflag [#allocation6], %s1292_s16 }
 0x374   : > { %p1607_p10 = pnand %p1610_p8, %p1894_p9 }
 0x376   : > { %1761 = dma.done.wait (!%p1607_p10), %s1293_s25, 2048  }
 0x377   : > { %1763 = vsyncadd (!%p1607_p10), %s1293_s25, 4294965248  ;;  %s19_s28 = sadd.s32 1, %s1794_s28   ;;  %s2296_s9 = sld [smem:[#allocation8_spill]] }
 0x378   : > { %p16_p11 = scmp.ge.s32.totalorder %s19_s28, 10   ;;  %s2297_s11 = sld [smem:[#allocation9_spill]] }
 0x379   : > { %s2298_s21 = smov %s1770_s22  ;;  %s2299_s22 = smov %s1774_s23 }
 0x37a   : > { %s2300_s23 = smov %s1902_s13  ;;  %s2301_s24 = smov %s1786_s26 }
 0x37b   : > { %s2302_s25 = smov %s1790_s27  ;;  %18 = sbr.rel (!%p16_p11) target bundleno = 5 (0x5), region = 92 }
 0x37d   : > { %s2303_s26 = smov %s2296_s9 }
 0x37e   : > { %s2304_s27 = smov %s2297_s11 }
 0x382   :  { %1298 = vsyncpa [#allocation6], 1 }
 0x383   :  { %1300 = vsyncpa [#allocation6 + $0x1], 1 }

</bundles_post_ra>
